<compile_context>
chip_gen: v5e
topology: v5e:2x2
jax: 0.10.0
libtpu: 0.0.40
codegen_flags: <defaults>
</compile_context>

<pallas_src>
import functools

import numpy as np
import jax
import jax.numpy as jnp
from jax import lax
from jax.experimental import pallas as pl
from jax.experimental.pallas import tpu as pltpu


_NEG_INF = -1e30   # finite "minus infinity": keeps p * logp == 0 exactly (no NaN)
_LANE = 128


def _round_up(x, m):
    return (x + m - 1) // m * m


def _vmem_capacity_bytes():
    """Per-core VMEM capacity; conservative fallback (v7x = 64 MiB)."""
    try:
        info = pltpu.get_tpu_info()
        cap = getattr(info, "vmem_capacity_bytes", None)
        if cap:
            return int(cap)
    except Exception:
        pass
    return 64 * 1024 * 1024


# ---------------------------------------------------------------------------
# Shared math: masked softmax, entropy + diversity (information-maximization)
# loss and analytic dLoss/dlogits for a padded (Bp, Kp) f32 logits tile.
# ---------------------------------------------------------------------------
def _softmax_im_loss_grad(logits, *, n_valid, n_classes, approx_recip):
    bp, kp = logits.shape
    inv_b = jnp.float32(1.0 / n_valid)

    col_ok = lax.broadcasted_iota(jnp.int32, (bp, kp), 1) < n_classes
    row_ok = (lax.broadcasted_iota(jnp.int32, (bp, kp), 0) < n_valid
              ).astype(jnp.float32)
    row_ok1 = row_ok[:, :1]                                  # (Bp, 1)

    zl = jnp.where(col_ok, logits, _NEG_INF)
    m = jnp.max(zl, axis=1, keepdims=True)
    z = zl - m
    e = jnp.where(col_ok, jnp.exp(z), 0.0)
    s = jnp.sum(e, axis=1, keepdims=True)
    inv_s = pl.reciprocal(s, approx=approx_recip)
    p = e * inv_s                                            # 0 in padded columns
    logp = z - jnp.log(s)                                    # finite everywhere

    # entropy loss: mean over valid rows of -sum_k p log p
    ent_rows = -jnp.sum(p * logp, axis=1, keepdims=True)     # (Bp, 1)
    ent_loss = jnp.sum(ent_rows * row_ok1) * inv_b

    # diversity loss on the batch-marginal distribution
    eps = 1e-5
    msoft = jnp.sum(p * row_ok, axis=0, keepdims=True) * inv_b   # (1, Kp)
    div_loss = jnp.sum(msoft * jnp.log(msoft + eps))

    # analytic dLoss/dlogits (f32 end-to-end)
    g_ent = -(p * (logp + ent_rows)) * inv_b
    c = (jnp.log(msoft + eps) + msoft / (msoft + eps)) * inv_b   # (1, Kp)
    g_div = p * (c - jnp.sum(c * p, axis=1, keepdims=True))
    g = (g_ent + g_div) * row_ok                                 # zero padded rows
    db = jnp.sum(g, axis=0, keepdims=True)
    return g, db, ent_loss, div_loss


# ---------------------------------------------------------------------------
# Streamed fused kernel: one launch per adapt step, grid = (2, Dp // tk).
#   pass 0: accumulate logits into logits_ref, then loss / grad / b update.
#   pass 1: dW tile = x^T tile @ g, fused SGD on the W tile (in-place alias).
# The w_new index map is (k*pass, 0): the output block is only flushed with
# pass-1 data, so the aliased W buffer in HBM is never clobbered early.
# ---------------------------------------------------------------------------
def _fused_streamed_kernel(lr_ref, x_ref, xt_ref, w_ref, b_ref,
                           logits_ref, w_new_ref, b_new_ref, losses_ref,
                           g_ref, *, n_valid, n_classes, approx_recip):
    phase = pl.program_id(0)
    k = pl.program_id(1)
    nk = pl.num_programs(1)

    @pl.when(phase == 0)
    def _forward_and_grad():
        @pl.when(k == 0)
        def _init():
            logits_ref[...] = jnp.zeros_like(logits_ref)

        x_tile = x_ref[...]                                  # (Bp, tk) matmul dtype
        w_tile = w_ref[...].astype(x_tile.dtype)             # cast f32 master W per tile
        logits_ref[...] += jnp.dot(x_tile, w_tile,
                                   preferred_element_type=jnp.float32)

        @pl.when(k == nk - 1)
        def _finalize():
            logits = logits_ref[...] + b_ref[...]            # (Bp, Kp) f32
            logits_ref[...] = logits
            g, db, ent_loss, div_loss = _softmax_im_loss_grad(
                logits, n_valid=n_valid, n_classes=n_classes,
                approx_recip=approx_recip)
            g_ref[...] = g                                   # stays in VMEM (f32)
            b_new_ref[...] = b_ref[...] - lr_ref[0] * db     # fused bias update
            losses_ref[0] = ent_loss
            losses_ref[1] = div_loss
            losses_ref[2] = ent_loss + div_loss

    @pl.when(phase == 1)
    def _sgd_update():
        xt_tile = xt_ref[...].astype(jnp.float32)            # (tk, Bp), no transpose needed
        dw = jnp.dot(xt_tile, g_ref[...],
                     preferred_element_type=jnp.float32)     # (tk, Kp)
        w_new_ref[...] = w_ref[...] - lr_ref[0] * dw


# ---------------------------------------------------------------------------
# W-resident fast-path kernel: W is DMA'd HBM -> VMEM once, all `steps`
# forward / backward / SGD updates run in VMEM (D-chunked, static slices),
# W is written back to HBM once at the end.
# ---------------------------------------------------------------------------
def _resident_kernel(lr_ref, x_ref, xt_ref, w_hbm_ref, b_ref,
                     logits_ref, w_new_hbm_ref, b_new_ref, losses_ref,
                     w_vmem, dma_sem,
                     *, n_valid, n_classes, steps, dck, approx_recip):
    cp_in = pltpu.make_async_copy(w_hbm_ref, w_vmem, dma_sem)
    cp_in.start()
    cp_in.wait()

    b_new_ref[...] = b_ref[...]
    lr = lr_ref[0]
    n_ch = w_vmem.shape[0] // dck                            # static chunk count

    for _ in range(steps):                                   # static unroll (TTA: steps is small)
        # ---- forward: logits = x @ W + b, chunked over D (bounds temporaries) ----
        logits = jnp.zeros(logits_ref.shape, jnp.float32)
        for c in range(n_ch):
            lo, hi = c * dck, (c + 1) * dck
            x_c = x_ref[:, lo:hi].astype(jnp.float32)
            logits = logits + jnp.dot(x_c, w_vmem[lo:hi, :],
                                      preferred_element_type=jnp.float32)
        logits = logits + b_new_ref[...]

        g, db, ent_loss, div_loss = _softmax_im_loss_grad(
            logits, n_valid=n_valid, n_classes=n_classes, approx_recip=approx_recip)

        # ---- backward + fused SGD, chunked (no full (Dp, Kp) dW temporary) ----
        for c in range(n_ch):
            lo, hi = c * dck, (c + 1) * dck
            xt_c = xt_ref[lo:hi, :].astype(jnp.float32)
            dw_c = jnp.dot(xt_c, g, preferred_element_type=jnp.float32)
            w_vmem[lo:hi, :] = w_vmem[lo:hi, :] - lr * dw_c

        b_new_ref[...] = b_new_ref[...] - lr * db
        logits_ref[...] = logits                             # last step's pre-update logits
        losses_ref[0] = ent_loss
        losses_ref[1] = div_loss
        losses_ref[2] = ent_loss + div_loss

    cp_out = pltpu.make_async_copy(w_vmem, w_new_hbm_ref, dma_sem)
    cp_out.start()
    cp_out.wait()


# ---------------------------------------------------------------------------
# Wrappers around pallas_call
# ---------------------------------------------------------------------------
def _adapt_step_streamed(x_pad, xt_pad, w_pad, b_pad, lr_smem, *,
                         n_valid, n_classes, tk, approx_recip, vmem_limit):
    bp, dp = x_pad.shape
    kp = w_pad.shape[1]
    grid = (2, dp // tk)
    kernel = functools.partial(_fused_streamed_kernel, n_valid=n_valid,
                               n_classes=n_classes, approx_recip=approx_recip)
    return pl.pallas_call(
        kernel,
        grid=grid,
        in_specs=[
            pl.BlockSpec(memory_space=pltpu.MemorySpace.SMEM),      # lr scalar
            pl.BlockSpec((bp, tk), lambda p, k: (0, k)),            # x tiles
            pl.BlockSpec((tk, bp), lambda p, k: (k, 0)),            # x^T tiles
            pl.BlockSpec((tk, kp), lambda p, k: (k, 0)),            # W tiles (both passes)
            pl.BlockSpec((1, kp), lambda p, k: (0, 0)),             # b (resident)
        ],
        out_specs=(
            pl.BlockSpec((bp, kp), lambda p, k: (0, 0)),            # logits (accumulator)
            pl.BlockSpec((tk, kp), lambda p, k: (k * p, 0)),        # W_new (pass-1 only)
            pl.BlockSpec((1, kp), lambda p, k: (0, 0)),             # b_new
            pl.BlockSpec(memory_space=pltpu.MemorySpace.SMEM),      # [ent, div, total]
        ),
        out_shape=(
            jax.ShapeDtypeStruct((bp, kp), jnp.float32),
            jax.ShapeDtypeStruct((dp, kp), jnp.float32),
            jax.ShapeDtypeStruct((1, kp), jnp.float32),
            jax.ShapeDtypeStruct((3,), jnp.float32),
        ),
        scratch_shapes=[pltpu.VMEM((bp, kp), jnp.float32)],         # g = dLoss/dlogits (f32)
        input_output_aliases={3: 1},                                # W updated in place
        compiler_params=pltpu.CompilerParams(
            dimension_semantics=("arbitrary", "arbitrary"),
            vmem_limit_bytes=vmem_limit),
    )(lr_smem, x_pad, xt_pad, w_pad, b_pad)


def _adapt_resident(x_pad, xt_pad, w_pad, b_pad, lr_smem, *,
                    n_valid, n_classes, steps, dck, approx_recip, vmem_limit):
    bp, dp = x_pad.shape
    kp = w_pad.shape[1]
    kernel = functools.partial(_resident_kernel, n_valid=n_valid, n_classes=n_classes,
                               steps=steps, dck=dck, approx_recip=approx_recip)
    return pl.pallas_call(
        kernel,
        grid=(1,),
        in_specs=[
            pl.BlockSpec(memory_space=pltpu.MemorySpace.SMEM),      # lr scalar
            pl.BlockSpec((bp, dp), lambda i: (0, 0)),               # x (VMEM resident)
            pl.BlockSpec((dp, bp), lambda i: (0, 0)),               # x^T (VMEM resident)
            pl.BlockSpec(memory_space=pl.ANY),                      # W stays in HBM; manual DMA
            pl.BlockSpec((1, kp), lambda i: (0, 0)),                # b
        ],
        out_specs=(
            pl.BlockSpec((bp, kp), lambda i: (0, 0)),               # logits (last step, pre-update)
            pl.BlockSpec(memory_space=pl.ANY),                      # W_new (written via DMA once)
            pl.BlockSpec((1, kp), lambda i: (0, 0)),                # b_new
            pl.BlockSpec(memory_space=pltpu.MemorySpace.SMEM),      # [ent, div, total]
        ),
        out_shape=(
            jax.ShapeDtypeStruct((bp, kp), jnp.float32),
            jax.ShapeDtypeStruct((dp, kp), jnp.float32),
            jax.ShapeDtypeStruct((1, kp), jnp.float32),
            jax.ShapeDtypeStruct((3,), jnp.float32),
        ),
        scratch_shapes=[pltpu.VMEM((dp, kp), jnp.float32),          # resident W working copy
                        pltpu.SemaphoreType.DMA],
        compiler_params=pltpu.CompilerParams(
            dimension_semantics=("arbitrary",),
            vmem_limit_bytes=vmem_limit),
    )(lr_smem, x_pad, xt_pad, w_pad, b_pad)


@functools.partial(jax.jit,
                   static_argnames=("steps", "tk", "matmul_dtype", "resident", "approx_recip"))
def tsd_adapt_forward(x, w, b, lr, *, steps=1, tk=None, matmul_dtype=jnp.bfloat16,
                      resident=None, approx_recip=False):
    """`steps` x (forward + analytic backward + fused SGD step) on the classifier head.

    Returns (logits_of_last_step_before_its_update, (w_new, b_new),
             (ent_loss, div_loss, total_loss)).
    """
    assert steps > 0
    B = x.shape[0]
    D = int(np.prod(x.shape[1:]))
    K = w.shape[1]
    Bp = _round_up(max(B, 1), 16)      # sublane / bf16-packing friendly batch
    Kp = _round_up(max(K, 1), 128)     # lane-dense class axis
    itemsize = np.dtype(matmul_dtype).itemsize

    cap = _vmem_capacity_bytes()
    budget = int(cap * 0.70)                             # headroom for compiler scratch
    vmem_limit = min(int(cap * 0.90), 124 * 1024 * 1024)

    # ---- W-resident fast-path feasibility (generation aware via VMEM capacity) ----
    dck = max(512, _round_up((D + 15) // 16, 128))       # <= ~16 chunks, multiple of 128
    Dp_res = _round_up(D, dck)
    resident_bytes = (
        Dp_res * Kp * 4                                  # resident W working copy (scratch)
        + 2 * Bp * Dp_res * itemsize                     # x block
        + 2 * Dp_res * _LANE * itemsize                  # x^T block (lane-padded to 128)
        + dck * Kp * 4 + dck * _LANE * 4 + dck * Bp * 4  # per-chunk f32 temporaries
        + 24 * Bp * Kp * 4)                              # logits / softmax / grad temporaries
    use_resident = bool(resident) if resident is not None else (resident_bytes <= budget)

    if use_resident:
        Dp = Dp_res
        tk_use = None
    else:
        tk_cap = 2048 if tk is None else int(tk)
        assert tk_cap % 128 == 0 and tk_cap >= 128
        tk_use = 128
        for cand in (2048, 1024, 512, 256, 128):         # biggest tile that fits the budget
            if cand > tk_cap:
                continue
            streamed_bytes = (
                4 * cand * Kp * 4                        # W in + W_new out tiles, double-buffered
                + 2 * Bp * cand * itemsize               # x tiles
                + 2 * cand * _LANE * itemsize            # x^T tiles (lane-padded)
                + cand * Kp * 4 + cand * _LANE * 4       # dW + f32-cast temporaries
                + 12 * Bp * Kp * 4)                      # logits block, g scratch, softmax temps
            if streamed_bytes <= budget:
                tk_use = cand
                break
        Dp = _round_up(D, tk_use)

    x_flat = x.reshape(B, D).astype(matmul_dtype)
    x_pad = jnp.zeros((Bp, Dp), matmul_dtype).at[:B, :D].set(x_flat)
    xt_pad = x_pad.T                                     # (Dp, Bp): dW matmul needs no transpose
    w_pad = jnp.zeros((Dp, Kp), jnp.float32).at[:D, :K].set(w.astype(jnp.float32))
    b_pad = jnp.zeros((1, Kp), jnp.float32).at[:, :K].set(b.astype(jnp.float32))
    lr_smem = jnp.reshape(jnp.asarray(lr, jnp.float32), (1,))

    if use_resident:
        logits, w_pad, b_pad, losses = _adapt_resident(
            x_pad, xt_pad, w_pad, b_pad, lr_smem,
            n_valid=B, n_classes=K, steps=steps, dck=dck,
            approx_recip=approx_recip, vmem_limit=vmem_limit)
    else:
        logits = None
        losses = None
        for _ in range(steps):
            logits, w_pad, b_pad, losses = _adapt_step_streamed(
                x_pad, xt_pad, w_pad, b_pad, lr_smem,
                n_valid=B, n_classes=K, tk=tk_use,
                approx_recip=approx_recip, vmem_limit=vmem_limit)

    return (logits[:B, :K],
            (w_pad[:D, :K], b_pad[:, :K]),
            (losses[0], losses[1], losses[2]))


# ---------------------------------------------------------------------------
# Pure-JAX f32 autodiff references
# ---------------------------------------------------------------------------
def _reference_f32(x, w, b):
    B = x.shape[0]
    x_flat = x.reshape(B, -1).astype(jnp.float32)

    def loss_fn(w, b):
        logits = jnp.dot(x_flat, w, precision=lax.Precision.HIGHEST) + b
        p = jax.nn.softmax(logits, axis=1)
        logp = jax.nn.log_softmax(logits, axis=1)
        ent_loss = (-(p * logp).sum(1)).mean(0)
        msoft = p.mean(0)
        div_loss = jnp.sum(msoft * jnp.log(msoft + 1e-5))
        return ent_loss + div_loss, (logits, ent_loss, div_loss)

    (loss, (logits, ent, div)), (dw, db) = jax.value_and_grad(
        loss_fn, argnums=(0, 1), has_aux=True)(w, b)
    return logits, ent, div, loss, dw, db


def _reference_multi_step(x, w, b, lr, steps):
    wj = jnp.asarray(w, jnp.float32)
    bj = jnp.asarray(b, jnp.float32)
    logits = None
    for _ in range(steps):
        logits, _, _, _, dw, db = _reference_f32(x, wj, bj)
        wj = wj - lr * dw
        bj = bj - lr * db
    return logits, wj, bj


if __name__ == "__main__":
    key = jax.random.PRNGKey(0)
    kx, kw, kb = jax.random.split(key, 3)

    B, C, H, W = 2, 4, 16, 16          # NCHW input
    K = 8                              # classes
    D = C * H * W                      # 1024 features
    lr = 1e-3

    x = jax.random.normal(kx, (B, C, H, W), dtype=jnp.float32)
    w = 0.02 * jax.random.normal(kw, (D, K), dtype=jnp.float32)
    b = 0.01 * jax.random.normal(kb, (1, K), dtype=jnp.float32)

    ref_logits, ref_ent, ref_div, ref_loss, ref_dw, ref_db = _reference_f32(x, w, b)
    ref_w1 = w - lr * ref_dw
    ref_b1 = b - lr * ref_db

    # --- f32, W-resident fast path: W read/written once, everything in VMEM ---
    out, (w1, b1), (ent, div, loss) = tsd_adapt_forward(
        x, w, b, lr, steps=1, matmul_dtype=jnp.float32, resident=True)
    jax.block_until_ready((out, w1, b1, loss))
    np.testing.assert_allclose(np.asarray(out), np.asarray(ref_logits), rtol=1e-4, atol=1e-4)
    np.testing.assert_allclose(float(ent), float(ref_ent), rtol=1e-4, atol=1e-4)
    np.testing.assert_allclose(float(div), float(ref_div), rtol=1e-4, atol=1e-4)
    np.testing.assert_allclose(float(loss), float(ref_loss), rtol=1e-4, atol=1e-4)
    np.testing.assert_allclose(np.asarray(w1), np.asarray(ref_w1), rtol=1e-5, atol=1e-6)
    np.testing.assert_allclose(np.asarray(b1), np.asarray(ref_b1), rtol=1e-5, atol=1e-6)

    # --- f32, streamed fused path (forced), multi-tile over D (tk=256 -> 4 tiles) ---
    out_s, (w1_s, b1_s), (ent_s, div_s, loss_s) = tsd_adapt_forward(
        x, w, b, lr, steps=1, tk=256, matmul_dtype=jnp.float32, resident=False)
    jax.block_until_ready((out_s, w1_s, b1_s, loss_s))
    np.testing.assert_allclose(np.asarray(out_s), np.asarray(ref_logits), rtol=1e-4, atol=1e-4)
    np.testing.assert_allclose(float(loss_s), float(ref_loss), rtol=1e-4, atol=1e-4)
    np.testing.assert_allclose(np.asarray(w1_s), np.asarray(ref_w1), rtol=1e-5, atol=1e-6)
    np.testing.assert_allclose(np.asarray(b1_s), np.asarray(ref_b1), rtol=1e-5, atol=1e-6)
    dw_rec = (np.asarray(w) - np.asarray(w1_s)) / lr      # implied gradients from in-place update
    db_rec = (np.asarray(b) - np.asarray(b1_s)) / lr
    np.testing.assert_allclose(dw_rec, np.asarray(ref_dw), rtol=1e-3, atol=2e-4)
    np.testing.assert_allclose(db_rec, np.asarray(ref_db), rtol=1e-3, atol=1e-4)

    # --- bf16 production path (auto dispatch -> resident at this size) ---
    out_bf, (w_bf, b_bf), (ent_bf, div_bf, loss_bf) = tsd_adapt_forward(
        x, w, b, lr, steps=1, matmul_dtype=jnp.bfloat16)
    jax.block_until_ready((out_bf, w_bf, b_bf, loss_bf))
    np.testing.assert_allclose(np.asarray(out_bf), np.asarray(ref_logits), rtol=5e-2, atol=5e-2)
    np.testing.assert_allclose(float(loss_bf), float(ref_loss), rtol=5e-2, atol=1e-1)
    np.testing.assert_allclose(np.asarray(w_bf), np.asarray(ref_w1), rtol=1e-2, atol=1e-4)

    # --- steps=2: in-kernel multi-step (resident) vs a 2-step f32 reference ---
    ref2_logits, ref2_w, ref2_b = _reference_multi_step(x, w, b, lr, 2)
    out2, (w2, b2), _ = tsd_adapt_forward(
        x, w, b, lr, steps=2, matmul_dtype=jnp.float32, resident=True)
    jax.block_until_ready((out2, w2, b2))
    np.testing.assert_allclose(np.asarray(out2), np.asarray(ref2_logits), rtol=1e-4, atol=1e-4)
    np.testing.assert_allclose(np.asarray(w2), np.asarray(ref2_w), rtol=1e-5, atol=2e-6)
    np.testing.assert_allclose(np.asarray(b2), np.asarray(ref2_b), rtol=1e-5, atol=2e-6)

    # --- steps=2, streamed bf16 path: exercise the per-step fused launch loop ---
    out2s, (w2s, b2s), _ = tsd_adapt_forward(
        x, w, b, lr, steps=2, tk=256, matmul_dtype=jnp.bfloat16, resident=False)
    jax.block_until_ready((out2s, w2s, b2s))

    print("KERNEL_OK")
</pallas_src>

<mosaic_0001>
module attributes {stable_mosaic.version = 11 : i64} {
  func.func @_resident_kernel(%arg0: i32, %arg1: memref<1xf32, #tpu.memory_space<smem>>, %arg2: memref<16x1024xf32, #tpu.memory_space<vmem>>, %arg3: memref<1024x16xf32, #tpu.memory_space<vmem>>, %arg4: memref<1024x128xf32, #tpu.memory_space<any>>, %arg5: memref<1x128xf32, #tpu.memory_space<vmem>>, %arg6: memref<16x128xf32, #tpu.memory_space<vmem>>, %arg7: memref<1024x128xf32, #tpu.memory_space<any>>, %arg8: memref<1x128xf32, #tpu.memory_space<vmem>>, %arg9: memref<3xf32, #tpu.memory_space<smem>>, %arg10: memref<1024x128xf32, #tpu.memory_space<vmem>>, %arg11: memref<!tpu.dma_semaphore, #tpu.memory_space<semaphore_mem>>) attributes {dimension_semantics = [#tpu.dimension_semantics<arbitrary>], iteration_bounds = array<i64: 1>, scalar_prefetch = 0 : i64, scratch_operands = 2 : i64, tpu.core_type = #tpu.core_type<tc>, window_params = [{transform_indices = @transform_0, window_bounds = array<i64: 1>}, {pipeline_mode = #tpu.pipeline_mode<synchronous>, transform_indices = @transform_1, window_bounds = array<i64: 16, 1024>}, {pipeline_mode = #tpu.pipeline_mode<synchronous>, transform_indices = @transform_2, window_bounds = array<i64: 1024, 16>}, {}, {pipeline_mode = #tpu.pipeline_mode<synchronous>, transform_indices = @transform_4, window_bounds = array<i64: 1, 128>}, {pipeline_mode = #tpu.pipeline_mode<synchronous>, transform_indices = @transform_5, window_bounds = array<i64: 16, 128>}, {}, {pipeline_mode = #tpu.pipeline_mode<synchronous>, transform_indices = @transform_7, window_bounds = array<i64: 1, 128>}, {transform_indices = @transform_8, window_bounds = array<i64: 3>}]} {
    tpu.enqueue_dma source(%arg4 : memref<1024x128xf32, #tpu.memory_space<any>>) target(%arg10 : memref<1024x128xf32, #tpu.memory_space<vmem>>) target_semaphore(%arg11 : memref<!tpu.dma_semaphore, #tpu.memory_space<semaphore_mem>>)
    tpu.wait_dma2 semaphore(%arg11 : memref<!tpu.dma_semaphore, #tpu.memory_space<semaphore_mem>>) src(%arg4 : memref<1024x128xf32, #tpu.memory_space<any>>) dst(%arg10 : memref<1024x128xf32, #tpu.memory_space<vmem>>)
    %c0 = arith.constant 0 : index
    %c0_0 = arith.constant 0 : index
    %0 = vector.load %arg5[%c0, %c0_0] : memref<1x128xf32, #tpu.memory_space<vmem>>, vector<1x128xf32>
    %c0_1 = arith.constant 0 : index
    %c0_2 = arith.constant 0 : index
    %1 = vector.load %arg8[%c0_1, %c0_2] : memref<1x128xf32, #tpu.memory_space<vmem>>, vector<1x128xf32>
    tpu.vector_store %arg8[%c0_1, %c0_2], %0 {strides = array<i32>} : memref<1x128xf32, #tpu.memory_space<vmem>>, vector<1x128xf32>,
    %c0_3 = arith.constant 0 : index
    %2 = memref.load %arg1[%c0_3] : memref<1xf32, #tpu.memory_space<smem>>
    %cst = arith.constant 0.000000e+00 : f32
    %3 = vector.broadcast %cst : f32 to vector<16x128xf32>
    %c0_4 = arith.constant 0 : index
    %c0_5 = arith.constant 0 : index
    %4 = vector.load %arg2[%c0_4, %c0_5] : memref<16x1024xf32, #tpu.memory_space<vmem>>, vector<16x512xf32>
    %c0_6 = arith.constant 0 : index
    %c0_7 = arith.constant 0 : index
    %5 = vector.load %arg10[%c0_6, %c0_7] : memref<1024x128xf32, #tpu.memory_space<vmem>>, vector<512x128xf32>
    %cst_8 = arith.constant dense<0.000000e+00> : vector<16x128xf32>
    %6 = tpu.matmul %4, %5, %cst_8 {dimension_numbers = #tpu.dot_dimension_numbers<[1], [0], [0], [1], [0, 0, 1, 1], [], []>} : vector<16x512xf32>, vector<512x128xf32>, vector<16x128xf32> -> vector<16x128xf32>
    %7 = arith.addf %3, %6 : vector<16x128xf32>
    %c0_9 = arith.constant 0 : index
    %c512 = arith.constant 512 : index
    %8 = vector.load %arg2[%c0_9, %c512] : memref<16x1024xf32, #tpu.memory_space<vmem>>, vector<16x512xf32>
    %c512_10 = arith.constant 512 : index
    %c0_11 = arith.constant 0 : index
    %9 = vector.load %arg10[%c512_10, %c0_11] : memref<1024x128xf32, #tpu.memory_space<vmem>>, vector<512x128xf32>
    %cst_12 = arith.constant dense<0.000000e+00> : vector<16x128xf32>
    %10 = tpu.matmul %8, %9, %cst_12 {dimension_numbers = #tpu.dot_dimension_numbers<[1], [0], [0], [1], [0, 0, 1, 1], [], []>} : vector<16x512xf32>, vector<512x128xf32>, vector<16x128xf32> -> vector<16x128xf32>
    %11 = arith.addf %7, %10 : vector<16x128xf32>
    %c0_13 = arith.constant 0 : index
    %c0_14 = arith.constant 0 : index
    %12 = vector.load %arg8[%c0_13, %c0_14] : memref<1x128xf32, #tpu.memory_space<vmem>>, vector<1x128xf32>
    %13 = vector.broadcast %12 : vector<1x128xf32> to vector<16x128xf32>
    %14 = arith.addf %11, %13 : vector<16x128xf32>
    %15 = tpu.iota {dimensions = array<i32: 1>} : vector<16x128xi32>
    %c8_i32 = arith.constant 8 : i32
    %16 = vector.broadcast %c8_i32 : i32 to vector<16x128xi32>
    %17 = arith.cmpi slt, %15, %16 : vector<16x128xi32>
    %18 = tpu.iota {dimensions = array<i32: 0>} : vector<16x128xi32>
    %c2_i32 = arith.constant 2 : i32
    %19 = vector.broadcast %c2_i32 : i32 to vector<16x128xi32>
    %20 = arith.cmpi slt, %18, %19 : vector<16x128xi32>
    %21 = arith.extui %20 : vector<16x128xi1> to vector<16x128xi32>
    %22 = arith.sitofp %21 : vector<16x128xi32> to vector<16x128xf32>
    %23 = vector.extract_strided_slice %22 {offsets = [0, 0], sizes = [16, 1], strides = [1, 1]} : vector<16x128xf32> to vector<16x1xf32>
    %cst_15 = arith.constant -1.000000e+30 : f32
    %24 = vector.broadcast %cst_15 : f32 to vector<16x128xf32>
    %25 = arith.select %17, %14, %24 : vector<16x128xi1>, vector<16x128xf32>
    %cst_16 = arith.constant dense<0xFF800000> : vector<16xf32>
    %26 = vector.multi_reduction <maximumf>, %25, %cst_16 [1] : vector<16x128xf32> to vector<16xf32>
    %27 = vector.shape_cast %26 : vector<16xf32> to vector<16x1xf32>
    %28 = vector.broadcast %27 : vector<16x1xf32> to vector<16x128xf32>
    %29 = arith.subf %25, %28 : vector<16x128xf32>
    %30 = math.exp %29 : vector<16x128xf32>
    %cst_17 = arith.constant 0.000000e+00 : f32
    %31 = vector.broadcast %cst_17 : f32 to vector<16x128xf32>
    %32 = arith.select %17, %30, %31 : vector<16x128xi1>, vector<16x128xf32>
    %cst_18 = arith.constant dense<0.000000e+00> : vector<16xf32>
    %33 = vector.multi_reduction <add>, %32, %cst_18 [1] : vector<16x128xf32> to vector<16xf32>
    %34 = vector.shape_cast %33 : vector<16xf32> to vector<16x1xf32>
    %35 = tpu.reciprocal %34 : vector<16x1xf32> -> vector<16x1xf32>
    %36 = vector.broadcast %35 : vector<16x1xf32> to vector<16x128xf32>
    %37 = arith.mulf %32, %36 : vector<16x128xf32>
    %38 = math.log %34 : vector<16x1xf32>
    %39 = vector.broadcast %38 : vector<16x1xf32> to vector<16x128xf32>
    %40 = arith.subf %29, %39 : vector<16x128xf32>
    %41 = arith.mulf %37, %40 : vector<16x128xf32>
    %cst_19 = arith.constant dense<0.000000e+00> : vector<16xf32>
    %42 = vector.multi_reduction <add>, %41, %cst_19 [1] : vector<16x128xf32> to vector<16xf32>
    %43 = vector.shape_cast %42 : vector<16xf32> to vector<16x1xf32>
    %cst_20 = arith.constant 0.000000e+00 : f32
    %44 = vector.broadcast %cst_20 : f32 to vector<16x1xf32>
    %45 = arith.subf %44, %43 : vector<16x1xf32>
    %46 = arith.mulf %45, %23 : vector<16x1xf32>
    %47 = vector.shape_cast %46 : vector<16x1xf32> to vector<1x16x1xf32>
    %cst_21 = arith.constant dense<0.000000e+00> : vector<1xf32>
    %48 = vector.multi_reduction <add>, %47, %cst_21 [1, 2] : vector<1x16x1xf32> to vector<1xf32>
    %49 = vector.shape_cast %48 : vector<1xf32> to vector<1x1x1xf32>
    %50 = vector.extract %49[0, 0, 0] : f32 from vector<1x1x1xf32>
    %cst_22 = arith.constant 5.000000e-01 : f32
    %51 = arith.mulf %50, %cst_22 : f32
    %52 = arith.mulf %37, %22 : vector<16x128xf32>
    %cst_23 = arith.constant dense<0.000000e+00> : vector<128xf32>
    %53 = vector.multi_reduction <add>, %52, %cst_23 [0] : vector<16x128xf32> to vector<128xf32>
    %54 = vector.shape_cast %53 : vector<128xf32> to vector<1x128xf32>
    %cst_24 = arith.constant 5.000000e-01 : f32
    %55 = vector.broadcast %cst_24 : f32 to vector<1x128xf32>
    %56 = arith.mulf %54, %55 : vector<1x128xf32>
    %cst_25 = arith.constant 9.99999974E-6 : f32
    %57 = vector.broadcast %cst_25 : f32 to vector<1x128xf32>
    %58 = arith.addf %56, %57 : vector<1x128xf32>
    %59 = math.log %58 : vector<1x128xf32>
    %60 = arith.mulf %56, %59 : vector<1x128xf32>
    %61 = vector.shape_cast %60 : vector<1x128xf32> to vector<1x1x128xf32>
    %cst_26 = arith.constant dense<0.000000e+00> : vector<1xf32>
    %62 = vector.multi_reduction <add>, %61, %cst_26 [1, 2] : vector<1x1x128xf32> to vector<1xf32>
    %63 = vector.shape_cast %62 : vector<1xf32> to vector<1x1x1xf32>
    %64 = vector.extract %63[0, 0, 0] : f32 from vector<1x1x1xf32>
    %65 = vector.broadcast %45 : vector<16x1xf32> to vector<16x128xf32>
    %66 = arith.addf %40, %65 : vector<16x128xf32>
    %67 = arith.mulf %37, %66 : vector<16x128xf32>
    %cst_27 = arith.constant 0.000000e+00 : f32
    %68 = vector.broadcast %cst_27 : f32 to vector<16x128xf32>
    %69 = arith.subf %68, %67 : vector<16x128xf32>
    %cst_28 = arith.constant 5.000000e-01 : f32
    %70 = vector.broadcast %cst_28 : f32 to vector<16x128xf32>
    %71 = arith.mulf %69, %70 : vector<16x128xf32>
    %cst_29 = arith.constant 9.99999974E-6 : f32
    %72 = vector.broadcast %cst_29 : f32 to vector<1x128xf32>
    %73 = arith.addf %56, %72 : vector<1x128xf32>
    %74 = math.log %73 : vector<1x128xf32>
    %cst_30 = arith.constant 9.99999974E-6 : f32
    %75 = vector.broadcast %cst_30 : f32 to vector<1x128xf32>
    %76 = arith.addf %56, %75 : vector<1x128xf32>
    %77 = arith.divf %56, %76 : vector<1x128xf32>
    %78 = arith.addf %74, %77 : vector<1x128xf32>
    %cst_31 = arith.constant 5.000000e-01 : f32
    %79 = vector.broadcast %cst_31 : f32 to vector<1x128xf32>
    %80 = arith.mulf %78, %79 : vector<1x128xf32>
    %81 = vector.broadcast %80 : vector<1x128xf32> to vector<16x128xf32>
    %82 = arith.mulf %81, %37 : vector<16x128xf32>
    %cst_32 = arith.constant dense<0.000000e+00> : vector<16xf32>
    %83 = vector.multi_reduction <add>, %82, %cst_32 [1] : vector<16x128xf32> to vector<16xf32>
    %84 = vector.shape_cast %83 : vector<16xf32> to vector<16x1xf32>
    %85 = vector.broadcast %80 : vector<1x128xf32> to vector<16x128xf32>
    %86 = vector.broadcast %84 : vector<16x1xf32> to vector<16x128xf32>
    %87 = arith.subf %85, %86 : vector<16x128xf32>
    %88 = arith.mulf %37, %87 : vector<16x128xf32>
    %89 = arith.addf %71, %88 : vector<16x128xf32>
    %90 = arith.mulf %89, %22 : vector<16x128xf32>
    %cst_33 = arith.constant dense<0.000000e+00> : vector<128xf32>
    %91 = vector.multi_reduction <add>, %90, %cst_33 [0] : vector<16x128xf32> to vector<128xf32>
    %92 = vector.shape_cast %91 : vector<128xf32> to vector<1x128xf32>
    %c0_34 = arith.constant 0 : index
    %c0_35 = arith.constant 0 : index
    %93 = vector.load %arg3[%c0_34, %c0_35] : memref<1024x16xf32, #tpu.memory_space<vmem>>, vector<512x16xf32>
    %cst_36 = arith.constant dense<0.000000e+00> : vector<512x128xf32>
    %94 = tpu.matmul %93, %90, %cst_36 {dimension_numbers = #tpu.dot_dimension_numbers<[1], [0], [0], [1], [0, 0, 1, 1], [], []>} : vector<512x16xf32>, vector<16x128xf32>, vector<512x128xf32> -> vector<512x128xf32>
    %c0_37 = arith.constant 0 : index
    %c0_38 = arith.constant 0 : index
    %95 = vector.load %arg10[%c0_37, %c0_38] : memref<1024x128xf32, #tpu.memory_space<vmem>>, vector<512x128xf32>
    %96 = vector.broadcast %2 : f32 to vector<512x128xf32>
    %97 = arith.mulf %96, %94 : vector<512x128xf32>
    %98 = arith.subf %95, %97 : vector<512x128xf32>
    %c0_39 = arith.constant 0 : index
    %c0_40 = arith.constant 0 : index
    %99 = vector.load %arg10[%c0_39, %c0_40] : memref<1024x128xf32, #tpu.memory_space<vmem>>, vector<512x128xf32>
    tpu.vector_store %arg10[%c0_39, %c0_40], %98 {strides = array<i32>} : memref<1024x128xf32, #tpu.memory_space<vmem>>, vector<512x128xf32>,
    %c512_41 = arith.constant 512 : index
    %c0_42 = arith.constant 0 : index
    %100 = vector.load %arg3[%c512_41, %c0_42] : memref<1024x16xf32, #tpu.memory_space<vmem>>, vector<512x16xf32>
    %cst_43 = arith.constant dense<0.000000e+00> : vector<512x128xf32>
    %101 = tpu.matmul %100, %90, %cst_43 {dimension_numbers = #tpu.dot_dimension_numbers<[1], [0], [0], [1], [0, 0, 1, 1], [], []>} : vector<512x16xf32>, vector<16x128xf32>, vector<512x128xf32> -> vector<512x128xf32>
    %c512_44 = arith.constant 512 : index
    %c0_45 = arith.constant 0 : index
    %102 = vector.load %arg10[%c512_44, %c0_45] : memref<1024x128xf32, #tpu.memory_space<vmem>>, vector<512x128xf32>
    %103 = vector.broadcast %2 : f32 to vector<512x128xf32>
    %104 = arith.mulf %103, %101 : vector<512x128xf32>
    %105 = arith.subf %102, %104 : vector<512x128xf32>
    %c512_46 = arith.constant 512 : index
    %c0_47 = arith.constant 0 : index
    %106 = vector.load %arg10[%c512_46, %c0_47] : memref<1024x128xf32, #tpu.memory_space<vmem>>, vector<512x128xf32>
    tpu.vector_store %arg10[%c512_46, %c0_47], %105 {strides = array<i32>} : memref<1024x128xf32, #tpu.memory_space<vmem>>, vector<512x128xf32>,
    %c0_48 = arith.constant 0 : index
    %c0_49 = arith.constant 0 : index
    %107 = vector.load %arg8[%c0_48, %c0_49] : memref<1x128xf32, #tpu.memory_space<vmem>>, vector<1x128xf32>
    %108 = vector.broadcast %2 : f32 to vector<1x128xf32>
    %109 = arith.mulf %108, %92 : vector<1x128xf32>
    %110 = arith.subf %107, %109 : vector<1x128xf32>
    %c0_50 = arith.constant 0 : index
    %c0_51 = arith.constant 0 : index
    %111 = vector.load %arg8[%c0_50, %c0_51] : memref<1x128xf32, #tpu.memory_space<vmem>>, vector<1x128xf32>
    tpu.vector_store %arg8[%c0_50, %c0_51], %110 {strides = array<i32>} : memref<1x128xf32, #tpu.memory_space<vmem>>, vector<1x128xf32>,
    %c0_52 = arith.constant 0 : index
    %c0_53 = arith.constant 0 : index
    %112 = vector.load %arg6[%c0_52, %c0_53] : memref<16x128xf32, #tpu.memory_space<vmem>>, vector<16x128xf32>
    tpu.vector_store %arg6[%c0_52, %c0_53], %14 {strides = array<i32>} : memref<16x128xf32, #tpu.memory_space<vmem>>, vector<16x128xf32>,
    %c0_54 = arith.constant 0 : index
    %113 = memref.load %arg9[%c0_54] : memref<3xf32, #tpu.memory_space<smem>>
    memref.store %51, %arg9[%c0_54] : memref<3xf32, #tpu.memory_space<smem>>
    %c1 = arith.constant 1 : index
    %114 = memref.load %arg9[%c1] : memref<3xf32, #tpu.memory_space<smem>>
    memref.store %64, %arg9[%c1] : memref<3xf32, #tpu.memory_space<smem>>
    %115 = arith.addf %51, %64 : f32
    %c2 = arith.constant 2 : index
    %116 = memref.load %arg9[%c2] : memref<3xf32, #tpu.memory_space<smem>>
    memref.store %115, %arg9[%c2] : memref<3xf32, #tpu.memory_space<smem>>
    tpu.enqueue_dma source(%arg10 : memref<1024x128xf32, #tpu.memory_space<vmem>>) target(%arg7 : memref<1024x128xf32, #tpu.memory_space<any>>) target_semaphore(%arg11 : memref<!tpu.dma_semaphore, #tpu.memory_space<semaphore_mem>>)
    tpu.wait_dma2 semaphore(%arg11 : memref<!tpu.dma_semaphore, #tpu.memory_space<semaphore_mem>>) src(%arg10 : memref<1024x128xf32, #tpu.memory_space<vmem>>) dst(%arg7 : memref<1024x128xf32, #tpu.memory_space<any>>)
    return
  }
  func.func @transform_0(%arg0: i32) -> i32 {
    %c0_i32 = arith.constant 0 : i32
    %c0_i32_0 = arith.constant 0 : i32
    return %c0_i32 : i32
  }
  func.func @transform_1(%arg0: i32) -> (i32, i32) {
    %c0_i32 = arith.constant 0 : i32
    %c0_i32_0 = arith.constant 0 : i32
    %c0_i32_1 = arith.constant 0 : i32
    return %c0_i32, %c0_i32_0 : i32, i32
  }
  func.func @transform_2(%arg0: i32) -> (i32, i32) {
    %c0_i32 = arith.constant 0 : i32
    %c0_i32_0 = arith.constant 0 : i32
    %c0_i32_1 = arith.constant 0 : i32
    return %c0_i32, %c0_i32_0 : i32, i32
  }
  func.func @transform_4(%arg0: i32) -> (i32, i32) {
    %c0_i32 = arith.constant 0 : i32
    %c0_i32_0 = arith.constant 0 : i32
    %c0_i32_1 = arith.constant 0 : i32
    return %c0_i32, %c0_i32_0 : i32, i32
  }
  func.func @transform_5(%arg0: i32) -> (i32, i32) {
    %c0_i32 = arith.constant 0 : i32
    %c0_i32_0 = arith.constant 0 : i32
    %c0_i32_1 = arith.constant 0 : i32
    return %c0_i32, %c0_i32_0 : i32, i32
  }
  func.func @transform_7(%arg0: i32) -> (i32, i32) {
    %c0_i32 = arith.constant 0 : i32
    %c0_i32_0 = arith.constant 0 : i32
    %c0_i32_1 = arith.constant 0 : i32
    return %c0_i32, %c0_i32_0 : i32, i32
  }
  func.func @transform_8(%arg0: i32) -> i32 {
    %c0_i32 = arith.constant 0 : i32
    %c0_i32_0 = arith.constant 0 : i32
    return %c0_i32 : i32
  }
}

</mosaic_0001>

<bundles_post_ra>
// kernel: tsd_adapt_forward.1
= control target key start
LH: loop header
LB: loop body
LE: loop exit
PB: predicated region body
PF: predicated region fallthrough
CT: control target
= control target key end

     0   :  { %15 = vsyncpa [#allocation6], 0  ;;  %s4780_s0 = inlined_call_operand.<no memory space> [shape: f32[1], index: 0, kind: input, shape index: {}]   ;;  %s4781_s1 = inlined_call_operand.vmem [shape: f32[16,1024], index: 1, kind: input, shape index: {}]   ;;  %s4782_s2 = inlined_call_operand.vmem [shape: f32[1024,16], index: 2, kind: input, shape index: {}]   ;;  %s4783_s3 = inlined_call_operand.vmem [shape: f32[1024,128], index: 3, kind: input, shape index: {}]   ;;  %s4784_s4 = inlined_call_operand.vmem [shape: f32[1,128], index: 4, kind: input, shape index: {}]   ;;  %s4785_s5 = inlined_call_operand.vmem [shape: f32[16,128], index: 5, kind: output, shape index: {0}]   ;;  %s4786_s6 = inlined_call_operand.vmem [shape: f32[1024,128], index: 6, kind: output, shape index: {1}]   ;;  %s4787_s7 = inlined_call_operand.hbm [shape: f32[1,128], index: 7, kind: output, shape index: {2}]   ;;  %s4788_s8 = inlined_call_operand.vmem [shape: f32[3], index: 8, kind: output, shape index: {3}]  }
   0x1   :  { %16 = vsyncpa [#allocation7], 0  ;;  %v2767_v0 = vld [vmem:[%s4783_s3] sm:$0xff]  ;;  %v2772_v1 = vld [vmem:[%s4783_s3 + $0x8] sm:$0xff] }
   0x2   :  { %4898 = vst [vmem:[#allocation15_spill] sm:$0xff] %v2767_v0  ;;  %v2777_v2 = vld [vmem:[%s4783_s3 + $0x10] sm:$0xff]  ;;  %v2782_v3 = vld [vmem:[%s4783_s3 + $0x18] sm:$0xff]  ;;  %v2787_v4 = vld [vmem:[%s4783_s3 + $0x20] sm:$0xff] }
   0x3   :  { %4899 = vst [vmem:[#allocation16_spill] sm:$0xff] %v2772_v1  ;;  %v2792_v5 = vld [vmem:[%s4783_s3 + $0x28] sm:$0xff]  ;;  %v2797_v6 = vld [vmem:[%s4783_s3 + $0x30] sm:$0xff]  ;;  %v2802_v7 = vld [vmem:[%s4783_s3 + $0x38] sm:$0xff] }
   0x4   :  { %4900 = vst [vmem:[#allocation17_spill] sm:$0xff] %v2777_v2  ;;  %v2807_v8 = vld [vmem:[%s4783_s3 + $0x40] sm:$0xff]  ;;  %v2812_v9 = vld [vmem:[%s4783_s3 + $0x48] sm:$0xff]  ;;  %v2817_v10 = vld [vmem:[%s4783_s3 + $0x50] sm:$0xff] }
   0x5   :  { %4901 = vst [vmem:[#allocation18_spill] sm:$0xff] %v2782_v3  ;;  %v2822_v11 = vld [vmem:[%s4783_s3 + $0x58] sm:$0xff]  ;;  %v2827_v12 = vld [vmem:[%s4783_s3 + $0x60] sm:$0xff]  ;;  %v2832_v13 = vld [vmem:[%s4783_s3 + $0x68] sm:$0xff] }
   0x6   :  { %4902 = vst [vmem:[#allocation19_spill] sm:$0xff] %v2787_v4  ;;  %v2837_v14 = vld [vmem:[%s4783_s3 + $0x70] sm:$0xff]  ;;  %v2842_v15 = vld [vmem:[%s4783_s3 + $0x78] sm:$0xff]  ;;  %v2847_v16 = vld [vmem:[%s4783_s3 + $0x80] sm:$0xff] }
   0x7   :  { %4903 = vst [vmem:[#allocation20_spill] sm:$0xff] %v2792_v5  ;;  %v2852_v17 = vld [vmem:[%s4783_s3 + $0x88] sm:$0xff]  ;;  %v2857_v18 = vld [vmem:[%s4783_s3 + $0x90] sm:$0xff]  ;;  %v2862_v19 = vld [vmem:[%s4783_s3 + $0x98] sm:$0xff] }
   0x8   :  { %4904 = vst [vmem:[#allocation21_spill] sm:$0xff] %v2797_v6  ;;  %v2867_v20 = vld [vmem:[%s4783_s3 + $0xa0] sm:$0xff]  ;;  %v2872_v21 = vld [vmem:[%s4783_s3 + $0xa8] sm:$0xff]  ;;  %v2877_v22 = vld [vmem:[%s4783_s3 + $0xb0] sm:$0xff] }
   0x9   :  { %4905 = vst [vmem:[#allocation22_spill] sm:$0xff] %v2802_v7  ;;  %v2882_v23 = vld [vmem:[%s4783_s3 + $0xb8] sm:$0xff]  ;;  %v2887_v24 = vld [vmem:[%s4783_s3 + $0xc0] sm:$0xff]  ;;  %v2892_v25 = vld [vmem:[%s4783_s3 + $0xc8] sm:$0xff] }
   0xa   :  { %4906 = vst [vmem:[#allocation23_spill] sm:$0xff] %v2807_v8  ;;  %v2897_v26 = vld [vmem:[%s4783_s3 + $0xd0] sm:$0xff]  ;;  %v2902_v27 = vld [vmem:[%s4783_s3 + $0xd8] sm:$0xff]  ;;  %v2907_v28 = vld [vmem:[%s4783_s3 + $0xe0] sm:$0xff] }
   0xb   :  { %4907 = vst [vmem:[#allocation24_spill] sm:$0xff] %v2812_v9  ;;  %v2912_v29 = vld [vmem:[%s4783_s3 + $0xe8] sm:$0xff]  ;;  %v2917_v30 = vld [vmem:[%s4783_s3 + $0xf0] sm:$0xff]  ;;  %v2922_v31 = vld [vmem:[%s4783_s3 + $0xf8] sm:$0xff] }
   0xc   :  { %4908 = vst [vmem:[#allocation25_spill] sm:$0xff] %v2817_v10  ;;  %v2927_v32 = vld [vmem:[%s4783_s3 + $0x100] sm:$0xff]  ;;  %v2932_v33 = vld [vmem:[%s4783_s3 + $0x108] sm:$0xff]  ;;  %v2937_v34 = vld [vmem:[%s4783_s3 + $0x110] sm:$0xff] }
   0xd   :  { %4909 = vst [vmem:[#allocation26_spill] sm:$0xff] %v2822_v11  ;;  %v2942_v35 = vld [vmem:[%s4783_s3 + $0x118] sm:$0xff]  ;;  %v2947_v36 = vld [vmem:[%s4783_s3 + $0x120] sm:$0xff]  ;;  %v2952_v37 = vld [vmem:[%s4783_s3 + $0x128] sm:$0xff] }
   0xe   :  { %4910 = vst [vmem:[#allocation27_spill] sm:$0xff] %v2827_v12  ;;  %v2957_v38 = vld [vmem:[%s4783_s3 + $0x130] sm:$0xff]  ;;  %v2962_v39 = vld [vmem:[%s4783_s3 + $0x138] sm:$0xff]  ;;  %v2967_v40 = vld [vmem:[%s4783_s3 + $0x140] sm:$0xff] }
   0xf   :  { %4911 = vst [vmem:[#allocation28_spill] sm:$0xff] %v2832_v13  ;;  %v2972_v41 = vld [vmem:[%s4783_s3 + $0x148] sm:$0xff]  ;;  %v2977_v42 = vld [vmem:[%s4783_s3 + $0x150] sm:$0xff]  ;;  %v2982_v43 = vld [vmem:[%s4783_s3 + $0x158] sm:$0xff] }
  0x10   :  { %4912 = vst [vmem:[#allocation29_spill] sm:$0xff] %v2837_v14  ;;  %v2987_v44 = vld [vmem:[%s4783_s3 + $0x160] sm:$0xff]  ;;  %v2992_v45 = vld [vmem:[%s4783_s3 + $0x168] sm:$0xff]  ;;  %v2997_v46 = vld [vmem:[%s4783_s3 + $0x170] sm:$0xff] }
  0x11   :  { %4913 = vst [vmem:[#allocation30_spill] sm:$0xff] %v2842_v15  ;;  %v3002_v47 = vld [vmem:[%s4783_s3 + $0x178] sm:$0xff]  ;;  %v3007_v48 = vld [vmem:[%s4783_s3 + $0x180] sm:$0xff]  ;;  %v3012_v49 = vld [vmem:[%s4783_s3 + $0x188] sm:$0xff] }
  0x12   :  { %4914 = vst [vmem:[#allocation31_spill] sm:$0xff] %v2847_v16  ;;  %v3017_v50 = vld [vmem:[%s4783_s3 + $0x190] sm:$0xff]  ;;  %v3022_v51 = vld [vmem:[%s4783_s3 + $0x198] sm:$0xff]  ;;  %v3027_v52 = vld [vmem:[%s4783_s3 + $0x1a0] sm:$0xff] }
  0x13   :  { %4915 = vst [vmem:[#allocation32_spill] sm:$0xff] %v2852_v17  ;;  %v3032_v53 = vld [vmem:[%s4783_s3 + $0x1a8] sm:$0xff]  ;;  %v3037_v54 = vld [vmem:[%s4783_s3 + $0x1b0] sm:$0xff]  ;;  %v3042_v55 = vld [vmem:[%s4783_s3 + $0x1b8] sm:$0xff] }
  0x14   :  { %4916 = vst [vmem:[#allocation33_spill] sm:$0xff] %v2857_v18  ;;  %v3047_v56 = vld [vmem:[%s4783_s3 + $0x1c0] sm:$0xff]  ;;  %v3052_v57 = vld [vmem:[%s4783_s3 + $0x1c8] sm:$0xff]  ;;  %v3057_v58 = vld [vmem:[%s4783_s3 + $0x1d0] sm:$0xff] }
  0x15   :  { %4917 = vst [vmem:[#allocation34_spill] sm:$0xff] %v2862_v19  ;;  %v3062_v59 = vld [vmem:[%s4783_s3 + $0x1d8] sm:$0xff]  ;;  %v3067_v60 = vld [vmem:[%s4783_s3 + $0x1e0] sm:$0xff]  ;;  %v3072_v61 = vld [vmem:[%s4783_s3 + $0x1e8] sm:$0xff] }
  0x16   :  { %4918 = vst [vmem:[#allocation35_spill] sm:$0xff] %v2867_v20  ;;  %v3077_v62 = vld [vmem:[%s4783_s3 + $0x1f0] sm:$0xff]  ;;  %v3082_v63 = vld [vmem:[%s4783_s3 + $0x1f8] sm:$0xff]  ;;  %v3092_v16 = vld [vmem:[%s4783_s3 + $0x208] sm:$0xff] }
  0x17   :  { %4919 = vst [vmem:[#allocation36_spill] sm:$0xff] %v2872_v21  ;;  %v3107_v17 = vld [vmem:[%s4783_s3 + $0x220] sm:$0xff]  ;;  %v3112_v0 = vld [vmem:[%s4783_s3 + $0x228] sm:$0xff] }
  0x18   :  { %4920 = vst [vmem:[#allocation37_spill] sm:$0xff] %v2877_v22  ;;  %v3127_v18 = vld [vmem:[%s4783_s3 + $0x240] sm:$0xff]  ;;  %v3132_v1 = vld [vmem:[%s4783_s3 + $0x248] sm:$0xff] }
  0x19   :  { %4921 = vst [vmem:[#allocation38_spill] sm:$0xff] %v2882_v23  ;;  %v3147_v19 = vld [vmem:[%s4783_s3 + $0x260] sm:$0xff]  ;;  %v3152_v2 = vld [vmem:[%s4783_s3 + $0x268] sm:$0xff] }
  0x1a   :  { %4922 = vst [vmem:[#allocation39_spill] sm:$0xff] %v2887_v24  ;;  %v3167_v20 = vld [vmem:[%s4783_s3 + $0x280] sm:$0xff]  ;;  %v3172_v3 = vld [vmem:[%s4783_s3 + $0x288] sm:$0xff] }
  0x1b   :  { %4923 = vst [vmem:[#allocation40_spill] sm:$0xff] %v2892_v25  ;;  %v3187_v21 = vld [vmem:[%s4783_s3 + $0x2a0] sm:$0xff]  ;;  %v3192_v4 = vld [vmem:[%s4783_s3 + $0x2a8] sm:$0xff] }
  0x1c   :  { %4924 = vst [vmem:[#allocation41_spill] sm:$0xff] %v2897_v26  ;;  %v3207_v22 = vld [vmem:[%s4783_s3 + $0x2c0] sm:$0xff]  ;;  %v3212_v5 = vld [vmem:[%s4783_s3 + $0x2c8] sm:$0xff] }
  0x1d   :  { %4925 = vst [vmem:[#allocation42_spill] sm:$0xff] %v2902_v27  ;;  %v3227_v23 = vld [vmem:[%s4783_s3 + $0x2e0] sm:$0xff]  ;;  %v3232_v6 = vld [vmem:[%s4783_s3 + $0x2e8] sm:$0xff] }
  0x1e   :  { %4926 = vst [vmem:[#allocation43_spill] sm:$0xff] %v2907_v28  ;;  %v3247_v24 = vld [vmem:[%s4783_s3 + $0x300] sm:$0xff]  ;;  %v3252_v7 = vld [vmem:[%s4783_s3 + $0x308] sm:$0xff] }
  0x1f   :  { %4927 = vst [vmem:[#allocation44_spill] sm:$0xff] %v2912_v29  ;;  %v3267_v25 = vld [vmem:[%s4783_s3 + $0x320] sm:$0xff]  ;;  %v3272_v8 = vld [vmem:[%s4783_s3 + $0x328] sm:$0xff] }
  0x20   :  { %4928 = vst [vmem:[#allocation45_spill] sm:$0xff] %v2917_v30  ;;  %v3287_v26 = vld [vmem:[%s4783_s3 + $0x340] sm:$0xff]  ;;  %v3292_v9 = vld [vmem:[%s4783_s3 + $0x348] sm:$0xff] }
  0x21   :  { %4929 = vst [vmem:[#allocation46_spill] sm:$0xff] %v2922_v31  ;;  %v3307_v27 = vld [vmem:[%s4783_s3 + $0x360] sm:$0xff]  ;;  %v3312_v10 = vld [vmem:[%s4783_s3 + $0x368] sm:$0xff] }
  0x22   :  { %4930 = vst [vmem:[#allocation47_spill] sm:$0xff] %v2927_v32  ;;  %v3102_v32 = vld [vmem:[%s4783_s3 + $0x218] sm:$0xff]  ;;  %v3327_v28 = vld [vmem:[%s4783_s3 + $0x380] sm:$0xff]  ;;  %v3332_v11 = vld [vmem:[%s4783_s3 + $0x388] sm:$0xff] }
  0x23   :  { %4931 = vst [vmem:[#allocation48_spill] sm:$0xff] %v2932_v33  ;;  %v3122_v33 = vld [vmem:[%s4783_s3 + $0x238] sm:$0xff]  ;;  %v3347_v29 = vld [vmem:[%s4783_s3 + $0x3a0] sm:$0xff]  ;;  %v3352_v12 = vld [vmem:[%s4783_s3 + $0x3a8] sm:$0xff] }
  0x24   :  { %4932 = vst [vmem:[#allocation49_spill] sm:$0xff] %v2937_v34  ;;  %v3142_v34 = vld [vmem:[%s4783_s3 + $0x258] sm:$0xff]  ;;  %v3367_v30 = vld [vmem:[%s4783_s3 + $0x3c0] sm:$0xff]  ;;  %v3372_v13 = vld [vmem:[%s4783_s3 + $0x3c8] sm:$0xff] }
  0x25   :  { %4933 = vst [vmem:[#allocation50_spill] sm:$0xff] %v2942_v35  ;;  %v3162_v35 = vld [vmem:[%s4783_s3 + $0x278] sm:$0xff]  ;;  %v3387_v31 = vld [vmem:[%s4783_s3 + $0x3e0] sm:$0xff]  ;;  %v3392_v14 = vld [vmem:[%s4783_s3 + $0x3e8] sm:$0xff] }
  0x26   :  { %4934 = vst [vmem:[#allocation51_spill] sm:$0xff] %v2947_v36  ;;  %v3182_v36 = vld [vmem:[%s4783_s3 + $0x298] sm:$0xff] }
  0x27   :  { %4935 = vst [vmem:[#allocation52_spill] sm:$0xff] %v2952_v37  ;;  %v3202_v37 = vld [vmem:[%s4783_s3 + $0x2b8] sm:$0xff] }
  0x28   :  { %4936 = vst [vmem:[#allocation53_spill] sm:$0xff] %v2957_v38  ;;  %v3222_v38 = vld [vmem:[%s4783_s3 + $0x2d8] sm:$0xff] }
  0x29   :  { %4937 = vst [vmem:[#allocation54_spill] sm:$0xff] %v2962_v39  ;;  %v3242_v39 = vld [vmem:[%s4783_s3 + $0x2f8] sm:$0xff] }
  0x2a   :  { %4938 = vst [vmem:[#allocation55_spill] sm:$0xff] %v2967_v40  ;;  %v3262_v40 = vld [vmem:[%s4783_s3 + $0x318] sm:$0xff] }
  0x2b   :  { %4939 = vst [vmem:[#allocation56_spill] sm:$0xff] %v2972_v41  ;;  %v3282_v41 = vld [vmem:[%s4783_s3 + $0x338] sm:$0xff] }
  0x2c   :  { %4940 = vst [vmem:[#allocation57_spill] sm:$0xff] %v2977_v42  ;;  %v3302_v42 = vld [vmem:[%s4783_s3 + $0x358] sm:$0xff] }
  0x2d   :  { %4941 = vst [vmem:[#allocation58_spill] sm:$0xff] %v2982_v43  ;;  %v3322_v43 = vld [vmem:[%s4783_s3 + $0x378] sm:$0xff] }
  0x2e   :  { %4942 = vst [vmem:[#allocation59_spill] sm:$0xff] %v2987_v44  ;;  %v3342_v44 = vld [vmem:[%s4783_s3 + $0x398] sm:$0xff] }
  0x2f   :  { %4943 = vst [vmem:[#allocation60_spill] sm:$0xff] %v2992_v45  ;;  %v3362_v45 = vld [vmem:[%s4783_s3 + $0x3b8] sm:$0xff] }
  0x30   :  { %4944 = vst [vmem:[#allocation61_spill] sm:$0xff] %v2997_v46  ;;  %v3382_v46 = vld [vmem:[%s4783_s3 + $0x3d8] sm:$0xff] }
  0x31   :  { %4945 = vst [vmem:[#allocation62_spill] sm:$0xff] %v3002_v47 }
  0x32   :  { %4946 = vst [vmem:[#allocation63_spill] sm:$0xff] %v3007_v48  ;;  %v3087_v48 = vld [vmem:[%s4783_s3 + $0x200] sm:$0xff] }
  0x33   :  { %4947 = vst [vmem:[#allocation64_spill] sm:$0xff] %v3012_v49  ;;  %v3097_v49 = vld [vmem:[%s4783_s3 + $0x210] sm:$0xff] }
  0x34   :  { %4948 = vst [vmem:[#allocation65_spill] sm:$0xff] %v3017_v50  ;;  %v3117_v50 = vld [vmem:[%s4783_s3 + $0x230] sm:$0xff] }
  0x35   :  { %4949 = vst [vmem:[#allocation66_spill] sm:$0xff] %v3022_v51  ;;  %v3137_v51 = vld [vmem:[%s4783_s3 + $0x250] sm:$0xff] }
  0x36   :  { %4950 = vst [vmem:[#allocation67_spill] sm:$0xff] %v3027_v52  ;;  %v3157_v52 = vld [vmem:[%s4783_s3 + $0x270] sm:$0xff] }
  0x37   :  { %4951 = vst [vmem:[#allocation68_spill] sm:$0xff] %v3032_v53  ;;  %v3177_v53 = vld [vmem:[%s4783_s3 + $0x290] sm:$0xff] }
  0x38   :  { %4952 = vst [vmem:[#allocation69_spill] sm:$0xff] %v3037_v54  ;;  %v3197_v54 = vld [vmem:[%s4783_s3 + $0x2b0] sm:$0xff] }
  0x39   :  { %4953 = vst [vmem:[#allocation70_spill] sm:$0xff] %v3042_v55  ;;  %v3217_v55 = vld [vmem:[%s4783_s3 + $0x2d0] sm:$0xff] }
  0x3a   :  { %4954 = vst [vmem:[#allocation71_spill] sm:$0xff] %v3047_v56  ;;  %v3237_v56 = vld [vmem:[%s4783_s3 + $0x2f0] sm:$0xff] }
  0x3b   :  { %4955 = vst [vmem:[#allocation72_spill] sm:$0xff] %v3052_v57  ;;  %v3257_v57 = vld [vmem:[%s4783_s3 + $0x310] sm:$0xff] }
  0x3c   :  { %4956 = vst [vmem:[#allocation73_spill] sm:$0xff] %v3057_v58  ;;  %v3277_v58 = vld [vmem:[%s4783_s3 + $0x330] sm:$0xff] }
  0x3d   :  { %4957 = vst [vmem:[#allocation74_spill] sm:$0xff] %v3062_v59  ;;  %v3297_v59 = vld [vmem:[%s4783_s3 + $0x350] sm:$0xff] }
  0x3e   :  { %4958 = vst [vmem:[#allocation75_spill] sm:$0xff] %v3067_v60  ;;  %v3317_v60 = vld [vmem:[%s4783_s3 + $0x370] sm:$0xff] }
  0x3f   :  { %4959 = vst [vmem:[#allocation76_spill] sm:$0xff] %v3072_v61  ;;  %v3337_v61 = vld [vmem:[%s4783_s3 + $0x390] sm:$0xff] }
  0x40   :  { %4960 = vst [vmem:[#allocation77_spill] sm:$0xff] %v3077_v62  ;;  %v3357_v62 = vld [vmem:[%s4783_s3 + $0x3b0] sm:$0xff] }
  0x41   :  { %4961 = vst [vmem:[#allocation78_spill] sm:$0xff] %v3082_v63  ;;  %v3377_v63 = vld [vmem:[%s4783_s3 + $0x3d0] sm:$0xff] }
  0x42   :  { %4962 = vst [vmem:[#allocation79_spill] sm:$0xff] %v3137_v51 }
  0x43   :  { %4963 = vst [vmem:[#allocation80_spill] sm:$0xff] %v3142_v34 }
  0x44   :  { %4964 = vst [vmem:[#allocation81_spill] sm:$0xff] %v3147_v19 }
  0x45   :  { %4965 = vst [vmem:[#allocation82_spill] sm:$0xff] %v3152_v2 }
  0x46   :  { %4966 = vst [vmem:[#allocation83_spill] sm:$0xff] %v3157_v52 }
  0x47   :  { %4967 = vst [vmem:[#allocation84_spill] sm:$0xff] %v3162_v35 }
  0x48   :  { %4968 = vst [vmem:[#allocation85_spill] sm:$0xff] %v3167_v20  ;;  %v3402_v20 = vld [vmem:[%s4783_s3 + $0x3f8] sm:$0xff] }
  0x49   :  { %4969 = vst [vmem:[#allocation86_spill] sm:$0xff] %v3172_v3 }
  0x4a   :  { %4970 = vst [vmem:[#allocation87_spill] sm:$0xff] %v3177_v53 }
  0x4b   :  { %4971 = vst [vmem:[#allocation88_spill] sm:$0xff] %v3182_v36 }
  0x4c   :  { %4972 = vst [vmem:[#allocation89_spill] sm:$0xff] %v3187_v21 }
  0x4d   :  { %4973 = vst [vmem:[#allocation90_spill] sm:$0xff] %v3192_v4 }
  0x4e   :  { %4974 = vst [vmem:[#allocation91_spill] sm:$0xff] %v3197_v54 }
  0x4f   :  { %4975 = vst [vmem:[#allocation92_spill] sm:$0xff] %v3202_v37 }
  0x50   :  { %4976 = vst [vmem:[#allocation93_spill] sm:$0xff] %v3207_v22 }
  0x51   :  { %4977 = vst [vmem:[#allocation94_spill] sm:$0xff] %v3212_v5 }
  0x52   :  { %4978 = vst [vmem:[#allocation95_spill] sm:$0xff] %v3217_v55 }
  0x53   :  { %4979 = vst [vmem:[#allocation96_spill] sm:$0xff] %v3222_v38 }
  0x54   :  { %4980 = vst [vmem:[#allocation97_spill] sm:$0xff] %v3227_v23 }
  0x55   :  { %4981 = vst [vmem:[#allocation98_spill] sm:$0xff] %v3232_v6 }
  0x56   :  { %4982 = vst [vmem:[#allocation99_spill] sm:$0xff] %v3237_v56 }
  0x57   :  { %4983 = vst [vmem:[#allocation100_spill] sm:$0xff] %v3242_v39 }
  0x58   :  { %4984 = vst [vmem:[#allocation101_spill] sm:$0xff] %v3292_v9 }
  0x59   :  { %4985 = vst [vmem:[#allocation102_spill] sm:$0xff] %v3297_v59 }
  0x5a   :  { %4986 = vst [vmem:[#allocation103_spill] sm:$0xff] %v3302_v42 }
  0x5b   :  { %4987 = vst [vmem:[#allocation104_spill] sm:$0xff] %v3307_v27 }
  0x5c   :  { %4988 = vst [vmem:[#allocation105_spill] sm:$0xff] %v3312_v10 }
  0x5d   :  { %4989 = vst [vmem:[#allocation106_spill] sm:$0xff] %v3317_v60 }
  0x5e   :  { %4990 = vst [vmem:[#allocation107_spill] sm:$0xff] %v3322_v43 }
  0x5f   :  { %4991 = vst [vmem:[#allocation108_spill] sm:$0xff] %v3327_v28  ;;  %v3397_v28 = vld [vmem:[%s4783_s3 + $0x3f0] sm:$0xff] }
  0x60   :  { %4992 = vst [vmem:[#allocation109_spill] sm:$0xff] %v3332_v11 }
  0x61   :  { %4993 = vst [vmem:[#allocation110_spill] sm:$0xff] %v3337_v61 }
  0x62   :  { %4994 = vst [vmem:[#allocation111_spill] sm:$0xff] %v3342_v44 }
  0x63   :  { %4995 = vst [vmem:[#allocation112_spill] sm:$0xff] %v3347_v29 }
  0x64   :  { %4996 = vst [vmem:[#allocation113_spill] sm:$0xff] %v3352_v12 }
  0x65   :  { %4997 = vst [vmem:[#allocation114_spill] sm:$0xff] %v3357_v62 }
  0x66   :  { %4998 = vst [vmem:[#allocation115_spill] sm:$0xff] %v3362_v45 }
  0x67   :  { %4999 = vst [vmem:[#allocation116_spill] sm:$0xff] %v3367_v30 }
  0x68   :  { %5000 = vst [vmem:[#allocation117_spill] sm:$0xff] %v3372_v13 }
  0x69   :  { %5001 = vst [vmem:[#allocation118_spill] sm:$0xff] %v3377_v63 }
  0x6a   :  { %5002 = vst [vmem:[#allocation119_spill] sm:$0xff] %v3382_v46 }
  0x6b   :  { %5003 = vst [vmem:[#allocation120_spill] sm:$0xff] %v3387_v31 }
  0x6c   :  { %5004 = vst [vmem:[#allocation121_spill] sm:$0xff] %v3392_v14 }
  0x6d   :  { %5005 = vst [vmem:[#allocation122_spill] sm:$0xff] %v3397_v28 }
  0x6e   :  { %5006 = vst [vmem:[#allocation123_spill] sm:$0xff] %v3402_v20 }
  0x6f   :  { %296 = vsyncadd [#allocation3], 16384  ;;  %447 = vmatpush.msra.mxu0 %v3162_v35  ;;  %493 = vmatpush.msra.mxu2 %v3322_v43 }
  0x70   :  { %2708 = dma.done.wait [#allocation3], 16384 }
  0x71   :  { %2709 = vsyncadd [#allocation3], 4294950912  ;;  %470 = vmatpush.msra.mxu1 %v3242_v39  ;;  %516 = vmatpush.msra.mxu3 %v3402_v20  ;;  %v5007_v20 = vld [vmem:[#allocation85_spill] sm:$0xff]  ;;  %v5008_v39 = vld [vmem:[#allocation108_spill] sm:$0xff]  ;;  %vm741_vm14 = vcmask 1040384   ;;  %vm713_vm15 = vcmask 7168  }
  0x72   :  { %448 = vmatpush.msra.mxu0 %v3157_v52  ;;  %494 = vmatpush.msra.mxu2 %v3317_v60  ;;  %v5056_v43 = vld [vmem:[#allocation67_spill] sm:$0xff]  ;;  %v5061_v35 = vld [vmem:[#allocation16_spill] sm:$0xff] }
  0x73   :  { %471 = vmatpush.msra.mxu1 %v3237_v56  ;;  %517 = vmatpush.msra.mxu3 %v3397_v28  ;;  %v5009_v28 = vld [vmem:[#allocation29_spill] sm:$0xff]  ;;  %v5010_v56 = vld [vmem:[#allocation46_spill] sm:$0xff]  ;;  %v5066_v60 = vld [vmem:[#allocation32_spill] sm:$0xff] }
  0x74   :  { %449 = vmatpush.msra.mxu0 %v3152_v2  ;;  %495 = vmatpush.msra.mxu2 %v3312_v10  ;;  %v5069_v52 = vld [vmem:[#allocation31_spill] sm:$0xff] }
  0x75   :  { %472 = vmatpush.msra.mxu1 %v3232_v6  ;;  %518 = vmatpush.msra.mxu3 %v3392_v14  ;;  %v5011_v14 = vld [vmem:[#allocation61_spill] sm:$0xff]  ;;  %v5012_v6 = vld [vmem:[#allocation78_spill] sm:$0xff]  ;;  %v308_v10 = vld [vmem:[%s4781_s1 + $0x48] sm:$0xff] }
  0x76   :  { %450 = vmatpush.msra.mxu0 %v3147_v19  ;;  %496 = vmatpush.msra.mxu2 %v3307_v27 }
  0x77   :  { %473 = vmatpush.msra.mxu1 %v3227_v23  ;;  %519 = vmatpush.msra.mxu3 %v3387_v31  ;;  %v5013_v31 = vld [vmem:[#allocation28_spill] sm:$0xff]  ;;  %v5014_v23 = vld [vmem:[#allocation45_spill] sm:$0xff] }
  0x78   :  { %451 = vmatpush.msra.mxu0 %v3142_v34  ;;  %497 = vmatpush.msra.mxu2 %v3302_v42  ;;  %v637_v42 = vlaneseq }
  0x79   :  { %474 = vmatpush.msra.mxu1 %v3222_v38  ;;  %520 = vmatpush.msra.mxu3 %v3382_v46  ;;  %v5015_v46 = vld [vmem:[#allocation60_spill] sm:$0xff]  ;;  %v5016_v38 = vld [vmem:[#allocation77_spill] sm:$0xff] }
  0x7a   :  { %452 = vmatpush.msra.mxu0 %v3137_v51  ;;  %498 = vmatpush.msra.mxu2 %v3297_v59 }
  0x7b   :  { %475 = vmatpush.msra.mxu1 %v3217_v55  ;;  %521 = vmatpush.msra.mxu3 %v3377_v63  ;;  %v5017_v63 = vld [vmem:[#allocation27_spill] sm:$0xff]  ;;  %v5018_v55 = vld [vmem:[#allocation44_spill] sm:$0xff] }
  0x7c   :  { %453 = vmatpush.msra.mxu0 %v3132_v1  ;;  %499 = vmatpush.msra.mxu2 %v3292_v9 }
  0x7d   :  { %476 = vmatpush.msra.mxu1 %v3212_v5  ;;  %522 = vmatpush.msra.mxu3 %v3372_v13  ;;  %v5019_v13 = vld [vmem:[#allocation59_spill] sm:$0xff]  ;;  %v5020_v5 = vld [vmem:[#allocation76_spill] sm:$0xff] }
  0x7e   :  { %454 = vmatpush.msra.mxu0 %v3127_v18  ;;  %500 = vmatpush.msra.mxu2 %v3287_v26 }
  0x7f   :  { %477 = vmatpush.msra.mxu1 %v3207_v22  ;;  %523 = vmatpush.msra.mxu3 %v3367_v30  ;;  %v5022_v30 = vld [vmem:[#allocation43_spill] sm:$0xff] }
  0x80   :  { %455 = vmatpush.msra.mxu0 %v3122_v33  ;;  %501 = vmatpush.msra.mxu2 %v3282_v41  ;;  %v5024_v22 = vld [vmem:[#allocation75_spill] sm:$0xff] }
  0x81   :  { %478 = vmatpush.msra.mxu1 %v3202_v37  ;;  %524 = vmatpush.msra.mxu3 %v3362_v45  ;;  %v5026_v45 = vld [vmem:[#allocation42_spill] sm:$0xff] }
  0x82   :  { %456 = vmatpush.msra.mxu0 %v3117_v50  ;;  %502 = vmatpush.msra.mxu2 %v3277_v58  ;;  %v5028_v37 = vld [vmem:[#allocation74_spill] sm:$0xff] }
  0x83   :  { %479 = vmatpush.msra.mxu1 %v3197_v54  ;;  %525 = vmatpush.msra.mxu3 %v3357_v62  ;;  %v5030_v62 = vld [vmem:[#allocation41_spill] sm:$0xff] }
  0x84   :  { %457 = vmatpush.msra.mxu0 %v3112_v0  ;;  %503 = vmatpush.msra.mxu2 %v3272_v8  ;;  %v5032_v54 = vld [vmem:[#allocation73_spill] sm:$0xff] }
  0x85   :  { %480 = vmatpush.msra.mxu1 %v3192_v4  ;;  %526 = vmatpush.msra.mxu3 %v3352_v12  ;;  %v5034_v12 = vld [vmem:[#allocation40_spill] sm:$0xff]  ;;  %v5035_v4 = vld [vmem:[#allocation55_spill] sm:$0xff] }
  0x86   :  { %458 = vmatpush.msra.mxu0 %v3107_v17  ;;  %504 = vmatpush.msra.mxu2 %v3267_v25 }
  0x87   :  { %481 = vmatpush.msra.mxu1 %v3187_v21  ;;  %527 = vmatpush.msra.mxu3 %v3347_v29  ;;  %v5037_v29 = vld [vmem:[#allocation22_spill] sm:$0xff] }
  0x88   :  { %459 = vmatpush.msra.mxu0 %v3102_v32  ;;  %505 = vmatpush.msra.mxu2 %v3262_v40  ;;  %v5039_v21 = vld [vmem:[#allocation54_spill] sm:$0xff] }
  0x89   :  { %482 = vmatpush.msra.mxu1 %v3182_v36  ;;  %528 = vmatpush.msra.mxu3 %v3342_v44  ;;  %v5040_v44 = vld [vmem:[#allocation71_spill] sm:$0xff]  ;;  %v5042_v36 = vld [vmem:[#allocation38_spill] sm:$0xff] }
  0x8a   :  { %460 = vmatpush.msra.mxu0 %v3097_v49  ;;  %506 = vmatpush.msra.mxu2 %v3257_v57 }
  0x8b   :  { %483 = vmatpush.msra.mxu1 %v3177_v53  ;;  %529 = vmatpush.msra.mxu3 %v3337_v61  ;;  %v5045_v61 = vld [vmem:[#allocation20_spill] sm:$0xff] }
  0x8c   :  { %461 = vmatpush.msra.mxu0 %v3092_v16  ;;  %507 = vmatpush.msra.mxu2 %v3252_v7  ;;  %v5047_v53 = vld [vmem:[#allocation52_spill] sm:$0xff] }
  0x8d   :  { %484 = vmatpush.msra.mxu1 %v3172_v3  ;;  %530 = vmatpush.msra.mxu3 %v3332_v11  ;;  %v5050_v11 = vld [vmem:[#allocation36_spill] sm:$0xff]  ;;  %v5051_v3 = vld [vmem:[#allocation51_spill] sm:$0xff] }
  0x8e   :  { %462 = vmatpush.msra.mxu0 %v3087_v48  ;;  %508 = vmatpush.msra.mxu2 %v3247_v24 }
  0x8f   :  { %485 = vmatpush.msra.mxu1 %v5007_v20  ;;  %531 = vmatpush.msra.mxu3 %v5008_v39  ;;  %v5053_v39 = vld [vmem:[#allocation18_spill] sm:$0xff] }
  0x90   :  { %539 = vmatpush.msrb.mxu0 %v2842_v15  ;;  %585 = vmatpush.msrb.mxu2 %v3002_v47  ;;  %v5055_v20 = vld [vmem:[#allocation50_spill] sm:$0xff]  ;;  %v5063_v15 = vld [vmem:[#allocation48_spill] sm:$0xff] }
  0x91   :  { %562 = vmatpush.msrb.mxu1 %v5010_v56  ;;  %608 = vmatpush.msrb.mxu3 %v5012_v6  ;;  %v5021_v56 = vld [vmem:[#allocation26_spill] sm:$0xff] }
  0x92   :  { %540 = vmatpush.msrb.mxu0 %v5009_v28  ;;  %586 = vmatpush.msrb.mxu2 %v5011_v14  ;;  %v5023_v6 = vld [vmem:[#allocation58_spill] sm:$0xff]  ;;  %v5068_v14 = vld [vmem:[#allocation64_spill] sm:$0xff]  ;;  %v5070_v28 = vld [vmem:[#allocation63_spill] sm:$0xff] }
  0x93   :  { %563 = vmatpush.msrb.mxu1 %v5014_v23  ;;  %609 = vmatpush.msrb.mxu3 %v5016_v38  ;;  %v5025_v23 = vld [vmem:[#allocation25_spill] sm:$0xff]  ;;  %v5058_v47 = vld [vmem:[#allocation34_spill] sm:$0xff] }
  0x94   :  { %541 = vmatpush.msrb.mxu0 %v5013_v31  ;;  %587 = vmatpush.msrb.mxu2 %v5015_v46  ;;  %v5027_v38 = vld [vmem:[#allocation57_spill] sm:$0xff] }
  0x95   :  { %564 = vmatpush.msrb.mxu1 %v5018_v55  ;;  %610 = vmatpush.msrb.mxu3 %v5020_v5  ;;  %v377_v5 = vld [vmem:[%s4781_s1 + $0x30] sm:$0xff] }
  0x96   :  { %542 = vmatpush.msrb.mxu0 %v5017_v63  ;;  %588 = vmatpush.msrb.mxu2 %v5019_v13  ;;  %v5029_v55 = vld [vmem:[#allocation24_spill] sm:$0xff] }
  0x97   :  { %565 = vmatpush.msrb.mxu1 %v5022_v30  ;;  %611 = vmatpush.msrb.mxu3 %v5024_v22  ;;  %v5031_v30 = vld [vmem:[#allocation56_spill] sm:$0xff]  ;;  %v375_v22 = vld [vmem:[%s4781_s1 + $0x20] sm:$0xff] }
  0x98   :  { %543 = vmatpush.msrb.mxu0 %v5021_v56  ;;  %589 = vmatpush.msrb.mxu2 %v5023_v6 }
  0x99   :  { %566 = vmatpush.msrb.mxu1 %v5026_v45  ;;  %612 = vmatpush.msrb.mxu3 %v5028_v37  ;;  %v5033_v45 = vld [vmem:[#allocation23_spill] sm:$0xff]  ;;  %v378_v37 = vld [vmem:[%s4781_s1 + $0x38] sm:$0xff] }
  0x9a   :  { %544 = vmatpush.msrb.mxu0 %v5025_v23  ;;  %590 = vmatpush.msrb.mxu2 %v5027_v38 }
  0x9b   :  { %567 = vmatpush.msrb.mxu1 %v5030_v62  ;;  %613 = vmatpush.msrb.mxu3 %v5032_v54  ;;  %v5036_v62 = vld [vmem:[#allocation72_spill] sm:$0xff] }
  0x9c   :  { %545 = vmatpush.msrb.mxu0 %v5029_v55  ;;  %591 = vmatpush.msrb.mxu2 %v5031_v30  ;;  %v376_v54 = vld [vmem:[%s4781_s1 + $0x28] sm:$0xff] }
  0x9d   :  { %509 = vmatmul.f32.vlgmr.msra.gmra.mxu2 %v377_v5  ;;  %568 = vmatpush.msrb.mxu1 %v5034_v12  ;;  %v5038_v5 = vld [vmem:[#allocation39_spill] sm:$0xff]  ;;  %v5041_v12 = vld [vmem:[#allocation21_spill] sm:$0xff] }
  0x9e   :  { %546 = vmatpush.msrb.mxu0 %v5033_v45  ;;  %592 = vmatpush.msrb.mxu2 %v5035_v4 }
  0x9f   :  { %614 = vmatpush.msrb.mxu3 %v5036_v62  ;;  %463 = vmatmul.f32.vlgmr.msra.gmra.mxu0 %v375_v22  ;;  %v5043_v62 = vld [vmem:[#allocation53_spill] sm:$0xff]  ;;  %v5044_v22 = vld [vmem:[#allocation70_spill] sm:$0xff] }
  0xa0   :  { %532 = vmatmul.f32.vlgmr.msra.gmra.mxu3 %v378_v37  ;;  %547 = vmatpush.msrb.mxu0 %v5037_v29  ;;  %v381_v37 = vld [vmem:[%s4781_s1 + $0x70] sm:$0xff] }
  0xa1   :  { %569 = vmatpush.msrb.mxu1 %v5038_v5  ;;  %593 = vmatpush.msrb.mxu2 %v5039_v21  ;;  %v5046_v5 = vld [vmem:[#allocation37_spill] sm:$0xff] }
  0xa2   :  { %615 = vmatpush.msrb.mxu3 %v5040_v44  ;;  %486 = vmatmul.f32.vlgmr.msra.gmra.mxu1 %v376_v54  ;;  %v5048_v44 = vld [vmem:[#allocation69_spill] sm:$0xff]  ;;  %v379_v54 = vld [vmem:[%s4781_s1 + $0x60] sm:$0xff] }
  0xa3   :  { %548 = vmatpush.msrb.mxu0 %v5041_v12  ;;  %570 = vmatpush.msrb.mxu1 %v5042_v36  ;;  %v5049_v36 = vld [vmem:[#allocation19_spill] sm:$0xff] }
  0xa4   :  { %594 = vmatpush.msrb.mxu2 %v5043_v62  ;;  %616 = vmatpush.msrb.mxu3 %v5044_v22  ;;  %v382_v22 = vld [vmem:[%s4781_s1 + $0x78] sm:$0xff] }
  0xa5   :  { %549 = vmatpush.msrb.mxu0 %v5045_v61  ;;  %571 = vmatpush.msrb.mxu1 %v5046_v5  ;;  %v5052_v5 = vld [vmem:[#allocation68_spill] sm:$0xff] }
  0xa6   :  { %595 = vmatpush.msrb.mxu2 %v5047_v53  ;;  %617 = vmatpush.msrb.mxu3 %v5048_v44  ;;  %v380_v44 = vld [vmem:[%s4781_s1 + $0x68] sm:$0xff] }
  0xa7   :  { %512 = vmatmul.f32.gmra.mxu2 %v381_v37  ;;  %550 = vmatpush.msrb.mxu0 %v5049_v36  ;;  %v5054_v37 = vld [vmem:[#allocation35_spill] sm:$0xff] }
  0xa8   :  { %572 = vmatpush.msrb.mxu1 %v5050_v11  ;;  %596 = vmatpush.msrb.mxu2 %v5051_v3  ;;  %v5057_v11 = vld [vmem:[#allocation17_spill] sm:$0xff] }
  0xa9   :  { %618 = vmatpush.msrb.mxu3 %v5052_v5  ;;  %466 = vmatmul.f32.gmra.mxu0 %v379_v54  ;;  %v5059_v5 = vld [vmem:[#allocation49_spill] sm:$0xff]  ;;  %v5060_v54 = vld [vmem:[#allocation66_spill] sm:$0xff] }
  0xaa   :  { %535 = vmatmul.f32.gmra.mxu3 %v382_v22  ;;  %551 = vmatpush.msrb.mxu0 %v5053_v39  ;;  %v5062_v22 = vld [vmem:[#allocation33_spill] sm:$0xff] }
  0xab   :  { %573 = vmatpush.msrb.mxu1 %v5054_v37  ;;  %597 = vmatpush.msrb.mxu2 %v5055_v20  ;;  %v5064_v37 = vld [vmem:[#allocation65_spill] sm:$0xff] }
  0xac   :  { %619 = vmatpush.msrb.mxu3 %v5056_v43  ;;  %489 = vmatmul.f32.gmra.mxu1 %v380_v44  ;;  %v303_v44 = vld [vmem:[%s4781_s1] sm:$0xff]  ;;  %v305_v43 = vld [vmem:[%s4781_s1 + $0x10] sm:$0xff] }
  0xad   :  { %552 = vmatpush.msrb.mxu0 %v5057_v11  ;;  %574 = vmatpush.msrb.mxu1 %v5058_v47  ;;  %v5065_v47 = vld [vmem:[#allocation15_spill] sm:$0xff] }
  0xae   :  { %598 = vmatpush.msrb.mxu2 %v5059_v5  ;;  %620 = vmatpush.msrb.mxu3 %v5060_v54  ;;  %v5067_v54 = vld [vmem:[#allocation47_spill] sm:$0xff] }
  0xaf   :  { %553 = vmatpush.msrb.mxu0 %v5061_v35  ;;  %575 = vmatpush.msrb.mxu1 %v5062_v22  ;;  %v306_v22 = vld [vmem:[%s4781_s1 + $0x18] sm:$0xff] }
  0xb0   :  { %599 = vmatpush.msrb.mxu2 %v5063_v15  ;;  %621 = vmatpush.msrb.mxu3 %v5064_v37  ;;  %v304_v37 = vld [vmem:[%s4781_s1 + $0x8] sm:$0xff] }
  0xb1   :  { %554 = vmatpush.msrb.mxu0 %v5065_v47  ;;  %576 = vmatpush.msrb.mxu1 %v5066_v60  ;;  %v309_v60 = vld [vmem:[%s4781_s1 + $0x50] sm:$0xff] }
  0xb2   :  { %600 = vmatpush.msrb.mxu2 %v5067_v54  ;;  %622 = vmatpush.msrb.mxu3 %v5068_v14  ;;  %v307_v14 = vld [vmem:[%s4781_s1 + $0x40] sm:$0xff] }
  0xb3   :  { %555 = vmatmul.f32.vlgmr.msrb.gmra.mxu0 %v303_v44  ;;  %601 = vmatmul.f32.vlgmr.msrb.gmra.mxu2 %v305_v43  ;;  %v310_v43 = vld [vmem:[%s4781_s1 + $0x58] sm:$0xff] }
  0xb4   :  { %577 = vmatpush.msrb.mxu1 %v5069_v52  ;;  %623 = vmatpush.msrb.mxu3 %v5070_v28 }
  0xb5   :  { %578 = vmatmul.f32.vlgmr.msrb.gmra.mxu1 %v304_v37  ;;  %624 = vmatmul.f32.vlgmr.msrb.gmra.mxu3 %v306_v22  ;;  %v300_v37 = vld [vmem:[%s4784_s4] sm:$0x1] }
  0xb6   :  { %301 = vst [vmem:[#allocation5] sm:$0x1] %v300_v37  ;;  %v638_v37 = vand.u32 127, %v637_v42 }
  0xb8   :  { %vm639_vm0 = vcmp.lt.s32.totalorder %v638_v37, 8  ;;  %v641_v37 = vshrl.u32 %v637_v42, 7 }
  0xba   :  { %vm643_vm6 = vcmp.lt.s32.totalorder %v641_v37, 2 }
  0xbb   :  { %558 = vmatmul.f32.gmra.mxu0 %v307_v14  ;;  %604 = vmatmul.f32.gmra.mxu2 %v309_v60 }
  0xbd   :  { %581 = vmatmul.f32.gmra.mxu1 %v308_v10  ;;  %627 = vmatmul.f32.gmra.mxu3 %v310_v43  ;;  %v2655_v51 = vld [vmem:[#allocation5] ss:$0 sm:$0xff] }
 0x11c   :  { %v464_v22 = vpop.f32.mrf.mxu0 }
 0x11f   :  { %v487_v44 = vpop.f32.mrf.mxu1 }
 0x120   :  { %v510_v28 = vpop.f32.mrf.mxu2  ;;  %v488_v2 = vadd.f32 %v487_v44, %v464_v22 }
 0x122   :  { %v511_v27 = vadd.f32 %v510_v28, %v488_v2 }
 0x123   :  { %v533_v52 = vpop.f32.mrf.mxu3 }
 0x124   :  { %v534_v19 = vadd.f32 %v533_v52, %v511_v27 }
 0x126   :  { %v467_v46 = vpop.f32.mrf.mxu0 }
 0x129   :  { %v490_v31 = vpop.f32.mrf.mxu1 }
 0x12a   :  { %v513_v13 = vpop.f32.mrf.mxu2  ;;  %v491_v63 = vadd.f32 %v490_v31, %v467_v46 }
 0x12c   :  { %v514_v6 = vadd.f32 %v513_v13, %v491_v63 }
 0x12d   :  { %v536_v14 = vpop.f32.mrf.mxu3 }
 0x12e   :  { %v537_v59 = vadd.f32 %v536_v14, %v514_v6 }
 0x130   :  { %v556_v60 = vpop.f32.mrf.mxu0 }
 0x131   :  { %v557_v10 = vadd.f32 %v556_v60, %v534_v19 }
 0x132   :  { %v579_v43 = vpop.f32.mrf.mxu1 }
 0x133   :  { %v580_v34 = vadd.f32 %v579_v43, %v557_v10 }
 0x136   :  { %v602_v56 = vpop.f32.mrf.mxu2 }
 0x137   :  { %v603_v38 = vadd.f32 %v602_v56, %v580_v34 }
 0x138   :  { %v559_v23 = vpop.f32.mrf.mxu0  ;;  %v625_v9 = vpop.f32.mrf.mxu3 }
 0x139   :  { %v560_v22 = vadd.f32 %v559_v23, %v537_v59  ;;  %v626_v44 = vadd.f32 %v625_v9, %v603_v38 }
 0x13a   :  { %v582_v2 = vpop.f32.mrf.mxu1 }
 0x13b   :  { %v635_v27 = vadd.f32 %v2655_v51, %v626_v44  ;;  %v583_v28 = vadd.f32 %v582_v2, %v560_v22 }
 0x13d   :  { %v649_v31 = vsel %vm639_vm0, %v635_v27, -1e+30  ;;  %2182 = vst [vmem:[%s4785_s5] sm:$0xff] %v635_v27 }
 0x13e   :  { %v605_v13 = vpop.f32.mrf.mxu2  ;;  %651 = vmax.xlane.f32.xlu0 %v649_v31 }
 0x13f   :  { %v606_v19 = vadd.f32 %v605_v13, %v583_v28 }
 0x140   :  { %v628_v6 = vpop.f32.mrf.mxu3 }
 0x141   :  { %v629_v34 = vadd.f32 %v628_v6, %v606_v19 }
 0x143   :  { %v636_v46 = vadd.f32 %v2655_v51, %v629_v34 }
 0x145   :  { %v650_v52 = vsel %vm639_vm0, %v636_v46, -1e+30  ;;  %2183 = vst [vmem:[%s4785_s5 + $0x8] sm:$0xff] %v636_v46 }
 0x146   :  { %653 = vmax.xlane.f32.xlu0 %v650_v52 }
 0x1b1   :  { %v652_v9 = vpop.xlane.xlu0 %651 }
 0x1b2   :  { %v3591_v23 = vsub.f32 %v649_v31, %v652_v9 }
 0x1b4   :  { %v657_v38 = vmul.f32 1.442695, %v3591_v23 }
 0x1b6   :  { %2656 = vpow2.f32 %v657_v38 }
 0x1b9   :  { %v654_v56 = vpop.xlane.xlu0 %653 }
 0x1ba   :  { %v656_v59 = vsub.f32 %v650_v52, %v654_v56 }
 0x1bc   :  { %v2657_v63 = vpop.eup %2656  ;;  %v659_v14 = vmul.f32 1.442695, %v656_v59 }
 0x1bd   :  { %v661_v60 = vsel %vm639_vm0, %v2657_v63, 0.0 }
 0x1be   :  { %2658 = vpow2.f32 %v659_v14  ;;  %663 = vadd.xlane.f32.xlu1 %v661_v60 }
 0x1c4   :  { %v2659_v51 = vpop.eup %2658 }
 0x1c5   :  { %v662_v10 = vsel %vm639_vm0, %v2659_v51, 0.0  ;;  %vm862_vm0 = vcmask 130048  }
 0x1c6   :  { %665 = vadd.xlane.f32.xlu1 %v662_v10 }
 0x231   :  { %v664_v43 = vpop.xlane.xlu1 %663 }
 0x232   :  { %2660 = vrcp.f32 %v664_v43  ;;  %v678_v19 = vand.u32 2147483648, %v664_v43  ;;  %vm672_vm2 = vweird.f32 %v664_v43  ;;  %v676_v6 = vand.u32 2147483647, %v664_v43 }
 0x234   :  { %v679_v38 = vor.u32 1.1754944e-38, %v678_v19  ;;  %vm677_vm4 = vcmp.eq.f32.partialorder %v676_v6, 8.507059e+37 }
 0x238   :  { %v2661_v22 = vpop.eup %2660 }
 0x239   :  { %v668_v44 = vmul.f32 %v2661_v22, %v664_v43  ;;  %v666_v2 = vpop.xlane.xlu1 %665  ;;  %vm673_vm1 = vweird.f32 %v2661_v22 }
 0x23a   :  { %2662 = vrcp.f32 %v666_v2  ;;  %vm674_vm3 = vmor %vm672_vm2, %vm673_vm1  ;;  %v692_v56 = vand.u32 2147483648, %v666_v2  ;;  %v690_v14 = vand.u32 2147483647, %v666_v2  ;;  %vm686_vm7 = vweird.f32 %v666_v2 }
 0x23b   :  { %v669_v27 = vsub.f32 1.0, %v668_v44  ;;  %2664 = vlog2.f32 %v666_v2 }
 0x23c   :  { %2666 = vlog2.f32 %v664_v43  ;;  %vm691_vm9 = vcmp.eq.f32.partialorder %v690_v14, 8.507059e+37 }
 0x23d   :  { %v670_v28 = vmul.f32 %v2661_v22, %v669_v27 }
 0x23f   :  { %v671_v31 = vadd.f32 %v2661_v22, %v670_v28  ;;  %v693_v28 = vor.u32 1.1754944e-38, %v692_v56 }
 0x240   :  { %v2663_v13 = vpop.eup %2662 }
 0x241   :  { %v682_v34 = vmul.f32 %v2663_v13, %v666_v2  ;;  %v675_v46 = vsel %vm674_vm3, %v2661_v22, %v671_v31  ;;  %v2665_v9 = vpop.eup %2664  ;;  %vm687_vm5 = vweird.f32 %v2663_v13  ;;  %v2716_v22 = vmov 0.0  }
 0x242   :  { %v680_v51 = vsel %vm677_vm4, %v679_v38, %v675_v46  ;;  %v700_v27 = vmul.f32 0.6931472, %v2665_v9  ;;  %vm688_vm8 = vmor %vm686_vm7, %vm687_vm5  ;;  %v3598_v31 = vsel %vm643_vm6, 1.0, %v2716_v22 }
 0x243   :  { %v683_v52 = vsub.f32 1.0, %v682_v34  ;;  %v3596_v42 = vmul.f32 %v680_v51, %v661_v60 }
 0x244   :  { %v702_v34 = vsub.f32 %v656_v59, %v700_v27 }
 0x245   :  { %v684_v63 = vmul.f32 %v2663_v13, %v683_v52  ;;  %v2667_v52 = vpop.eup %2666  ;;  %v727_v2 = vmul.f32 %v3598_v31, %v3596_v42 }
 0x247   :  { %v685_v44 = vadd.f32 %v2663_v13, %v684_v63 }
 0x249   :  { %v689_v30 = vsel %vm688_vm8, %v2663_v13, %v685_v44  ;;  %v698_v13 = vmul.f32 0.6931472, %v2667_v52 }
 0x24a   :  { %v694_v19 = vsel %vm691_vm9, %v693_v28, %v689_v30 }
 0x24b   :  { %v3600_v6 = vmul.f32 %v694_v19, %v662_v10  ;;  %v701_v9 = vsub.f32 %v3591_v23, %v698_v13 }
 0x24d   :  { %v704_v43 = vmul.f32 %v702_v34, %v3600_v6  ;;  %v728_v37 = vmul.f32 0.0, %v3600_v6  ;;  %v703_v30 = vmul.f32 %v701_v9, %v3596_v42 }
 0x24f   :  { %707 = vadd.xlane.f32.xlu2 %v704_v43  ;;  %v729_v46 = vadd.f32 %v728_v37, %v727_v2 }
 0x251   :  { %v730_v60 = vrot.slane %v729_v46, 4 }
 0x253   :  { %v731_v38 = vadd.f32 %v730_v60, %v729_v46 }
 0x255   :  { %v732_v10 = vrot.slane %v731_v38, 2 }
 0x257   :  { %705 = vadd.xlane.f32.xlu2 %v703_v30  ;;  %v733_v59 = vadd.f32 %v732_v10, %v731_v38 }
 0x259   :  { %v734_v56 = vrot.slane %v733_v59, 1 }
 0x25b   :  { %v735_v63 = vadd.f32 %v734_v56, %v733_v59 }
 0x25d   :  { %v736_v14 = vmul.f32 0.5, %v735_v63 }
 0x25f   :  { %v737_v51 = vadd.f32 1e-05, %v736_v14 }
 0x261   :  { %2668 = vrcp.f32 %v737_v51  ;;  %v771_v22 = vand.u32 2147483648, %v737_v51  ;;  %v769_v52 = vand.u32 2147483647, %v737_v51  ;;  %vm765_vm11 = vweird.f32 %v737_v51 }
 0x262   :  { %2670 = vlog2.f32 %v737_v51 }
 0x263   :  { %v772_v2 = vor.u32 1.1754944e-38, %v771_v22  ;;  %vm770_vm13 = vcmp.eq.f32.partialorder %v769_v52, 8.507059e+37 }
 0x267   :  { %v2669_v44 = vpop.eup %2668 }
 0x268   :  { %v761_v27 = vmul.f32 %v2669_v44, %v737_v51  ;;  %vm766_vm10 = vweird.f32 %v2669_v44  ;;  %v2671_v43 = vpop.eup %2670 }
 0x269   :  { %vm767_vm12 = vmor %vm765_vm11, %vm766_vm10  ;;  %v739_v46 = vmul.f32 0.6931472, %v2671_v43 }
 0x26a   :  { %v762_v28 = vsub.f32 1.0, %v761_v27 }
 0x26b   :  { %v740_v56 = vmul.f32 %v739_v46, %v736_v14 }
 0x26c   :  { %v763_v19 = vmul.f32 %v2669_v44, %v762_v28 }
 0x26d   :  { %v742_v63 = vsel %vm741_vm14, %v740_v56, 0.0 }
 0x26e   :  { %v764_v23 = vadd.f32 %v2669_v44, %v763_v19 }
 0x270   :  { %v768_v37 = vsel %vm767_vm12, %v2669_v44, %v764_v23 }
 0x271   :  { %v773_v13 = vsel %vm770_vm13, %v772_v2, %v768_v37 }
 0x272   :  { %v774_v60 = vmul.f32 %v773_v13, %v736_v14 }
 0x274   :  { %v775_v38 = vadd.f32 %v774_v60, %v739_v46 }
 0x276   :  { %v776_v30 = vmul.f32 0.5, %v775_v38 }
 0x278   :  { %v778_v10 = vmul.f32 %v776_v30, %v3600_v6  ;;  %v777_v59 = vmul.f32 %v776_v30, %v3596_v42 }
 0x27a   :  { %781 = vadd.xlane.f32.xlu0 %v778_v10  ;;  %779 = vadd.xlane.f32.xlu1 %v777_v59 }
 0x282   :  { %743 = vadd.xlane.f32.xlu0 %v742_v63 }
 0x2c2   :  { %v708_v51 = vpop.xlane.xlu2 %707 }
 0x2c3   :  { %v710_v27 = vsub.f32 0.0, %v708_v51 }
 0x2c5   :  { %v712_v44 = vmul.f32 0.0, %v710_v27  ;;  %v753_v2 = vadd.f32 %v710_v27, %v702_v34 }
 0x2c7   :  { %v715_v23 = vsel %vm713_vm15, %v712_v44, 0.0  ;;  %v755_v13 = vmul.f32 %v753_v2, %v3600_v6 }
 0x2c9   :  { %v757_v46 = vsub.f32 0.0, %v755_v13  ;;  %v1490_v13 = vld [vmem:[%s4782_s2 + $0x308] sm:$0xff] }
 0x2ca   :  { %v706_v28 = vpop.xlane.xlu2 %705 }
 0x2cb   :  { %v709_v22 = vsub.f32 0.0, %v706_v28  ;;  %v759_v63 = vmul.f32 0.5, %v757_v46  ;;  %v799_v46 = vld [vmem:[%s4782_s2 + $0x8] sm:$0xff] }
 0x2cd   :  { %v711_v19 = vmul.f32 %v3598_v31, %v709_v22  ;;  %v752_v37 = vadd.f32 %v709_v22, %v701_v9  ;;  %v1457_v22 = vld [vmem:[%s4782_s2 + $0x200] sm:$0xff] }
 0x2cf   :  { %v714_v52 = vsel %vm713_vm15, %v711_v19, 0.0  ;;  %v754_v14 = vmul.f32 %v752_v37, %v3596_v42  ;;  %v831_v37 = vld [vmem:[%s4782_s2 + $0x108] sm:$0xff] }
 0x2d0   :  { %v716_v43 = vadd.f32 %v715_v23, %v714_v52 }
 0x2d1   :  { %v756_v60 = vsub.f32 0.0, %v754_v14 }
 0x2d2   :  { %717 = vadd.xlane.f32.xlu2 %v716_v43 }
 0x2d3   :  { %v758_v51 = vmul.f32 0.5, %v756_v60  ;;  %v1458_v60 = vld [vmem:[%s4782_s2 + $0x208] sm:$0xff] }
 0x2ed   :  { %v782_v38 = vpop.xlane.xlu0 %781  ;;  %v780_v10 = vpop.xlane.xlu1 %779 }
 0x2ee   :  { %v784_v59 = vsub.f32 %v776_v30, %v782_v38  ;;  %v783_v56 = vsub.f32 %v776_v30, %v780_v10  ;;  %v830_v30 = vld [vmem:[%s4782_s2 + $0x100] sm:$0xff]  ;;  %v3647_v38 = vstv %s4780_s0 }
 0x2f0   :  { %v786_v28 = vmul.f32 %v784_v59, %v3600_v6  ;;  %v785_v44 = vmul.f32 %v783_v56, %v3596_v42  ;;  %v1489_v6 = vld [vmem:[%s4782_s2 + $0x300] sm:$0xff] }
 0x2f1   :  { %v2178_v59 = vld [vmem:[#allocation5] sm:$0x1] }
 0x2f2   :  { %v788_v19 = vadd.f32 %v786_v28, %v759_v63  ;;  %v787_v52 = vadd.f32 %v785_v44, %v758_v51  ;;  %v832_v51 = vld [vmem:[%s4782_s2 + $0x110] sm:$0xff] }
 0x2f3   :  { %v1491_v28 = vld [vmem:[%s4782_s2 + $0x310] sm:$0xff] }
 0x2f4   :  { %v790_v34 = vmul.f32 0.0, %v788_v19  ;;  %v789_v9 = vmul.f32 %v3598_v31, %v787_v52  ;;  %v798_v31 = vld [vmem:[%s4782_s2] sm:$0xff]  ;;  %v800_v44 = vld [vmem:[%s4782_s2 + $0x10] sm:$0xff]  ;;  %v833_v52 = vld [vmem:[%s4782_s2 + $0x118] sm:$0xff] }
 0x2f5   :  { %v1459_v19 = vld [vmem:[%s4782_s2 + $0x210] sm:$0xff] }
 0x2f6   :  { %v791_v27 = vadd.f32 %v790_v34, %v789_v9  ;;  %1069 = vmatpush.msra.mxu0 %v790_v34  ;;  %2644 = vmatpush.msra.mxu2 %v790_v34 }
 0x2f7   :  { %1727 = vmatpush.msra.mxu1 %v790_v34  ;;  %2646 = vmatpush.msra.mxu3 %v790_v34  ;;  %v1492_v34 = vld [vmem:[%s4782_s2 + $0x318] sm:$0xff] }
 0x2f8   :  { %v792_v42 = vrot.slane %v791_v27, 4  ;;  %1070 = vmatpush.msra.mxu0 %v789_v9  ;;  %2645 = vmatpush.msra.mxu2 %v789_v9 }
 0x2f9   :  { %1728 = vmatpush.msra.mxu1 %v789_v9  ;;  %2647 = vmatpush.msra.mxu3 %v789_v9  ;;  %v801_v9 = vld [vmem:[%s4782_s2 + $0x18] sm:$0xff] }
 0x2fa   :  { %v793_v23 = vadd.f32 %v792_v42, %v791_v27  ;;  %2547 = vmatmul.msk.f32.vlgmr.msra.gmra.mxu2 %vm862_vm0, %v830_v30  ;;  %2611 = vmatmul.msk.f32.vlgmr.msra.gmra.mxu3 %vm862_vm0, %v1489_v6  ;;  %v1460_v27 = vld [vmem:[%s4782_s2 + $0x218] sm:$0xff]  ;;  %v834_v30 = vld [vmem:[%s4782_s2 + $0x120] sm:$0xff] }
 0x2fb   :  { %2515 = vmatmul.msk.f32.vlgmr.msra.gmra.mxu0 %vm862_vm0, %v798_v31  ;;  %2579 = vmatmul.msk.f32.vlgmr.msra.gmra.mxu1 %vm862_vm0, %v1457_v22  ;;  %v1493_v6 = vld [vmem:[%s4782_s2 + $0x320] sm:$0xff]  ;;  %v835_v22 = vld [vmem:[%s4782_s2 + $0x128] sm:$0xff] }
 0x2fc   :  { %v794_v43 = vrot.slane %v793_v23, 2  ;;  %v802_v42 = vld [vmem:[%s4782_s2 + $0x20] sm:$0xff] }
 0x2fd   :  { %v1461_v31 = vld [vmem:[%s4782_s2 + $0x220] sm:$0xff] }
 0x2fe   :  { %v795_v2 = vadd.f32 %v794_v43, %v793_v23  ;;  %v1494_v23 = vld [vmem:[%s4782_s2 + $0x328] sm:$0xff] }
 0x2ff   :  { %v803_v43 = vld [vmem:[%s4782_s2 + $0x28] sm:$0xff] }
 0x300   :  { %v796_v14 = vrot.slane %v795_v2, 1 }
 0x302   :  { %v797_v10 = vadd.f32 %v796_v14, %v795_v2  ;;  %2548 = vmatmul.msk.f32.gmra.mxu2 %vm862_vm0, %v831_v37  ;;  %2612 = vmatmul.msk.f32.gmra.mxu3 %vm862_vm0, %v1490_v13  ;;  %v1462_v2 = vld [vmem:[%s4782_s2 + $0x228] sm:$0xff]  ;;  %v836_v37 = vld [vmem:[%s4782_s2 + $0x130] sm:$0xff] }
 0x303   :  { %2516 = vmatmul.msk.f32.gmra.mxu0 %vm862_vm0, %v799_v46  ;;  %2580 = vmatmul.msk.f32.gmra.mxu1 %vm862_vm0, %v1458_v60  ;;  %v1495_v13 = vld [vmem:[%s4782_s2 + $0x330] sm:$0xff]  ;;  %v837_v60 = vld [vmem:[%s4782_s2 + $0x138] sm:$0xff] }
 0x304   :  { %v2179_v56 = vmul.f32 %v3647_v38, %v797_v10  ;;  %v804_v14 = vld [vmem:[%s4782_s2 + $0x30] sm:$0xff]  ;;  %v1496_v10 = vld [vmem:[%s4782_s2 + $0x338] sm:$0xff] }
 0x305   :  { %v1463_v46 = vld [vmem:[%s4782_s2 + $0x230] sm:$0xff] }
 0x306   :  { %v2180_v63 = vsub.f32 %v2178_v59, %v2179_v56  ;;  %v805_v59 = vld [vmem:[%s4782_s2 + $0x38] sm:$0xff] }
 0x307   :  { %v1464_v56 = vld [vmem:[%s4782_s2 + $0x238] sm:$0xff] }
 0x308   :  { %2181 = vst [vmem:[#allocation5] sm:$0x1] %v2180_v63  ;;  %v838_v63 = vld [vmem:[%s4782_s2 + $0x140] sm:$0xff] }
 0x30a   :  { %2549 = vmatmul.msk.f32.gmra.mxu2 %vm862_vm0, %v832_v51  ;;  %2613 = vmatmul.msk.f32.gmra.mxu3 %vm862_vm0, %v1491_v28  ;;  %v1497_v51 = vld [vmem:[%s4782_s2 + $0x340] sm:$0xff] }
 0x30b   :  { %2517 = vmatmul.msk.f32.gmra.mxu0 %vm862_vm0, %v800_v44  ;;  %2581 = vmatmul.msk.f32.gmra.mxu1 %vm862_vm0, %v1459_v19  ;;  %v806_v28 = vld [vmem:[%s4782_s2 + $0x40] sm:$0xff]  ;;  %v744_v19 = vpop.xlane.xlu0 %743 }
 0x30c   :  { %v1465_v44 = vld [vmem:[%s4782_s2 + $0x240] sm:$0xff] }
 0x312   :  { %2550 = vmatmul.msk.f32.gmra.mxu2 %vm862_vm0, %v833_v52  ;;  %2614 = vmatmul.msk.f32.gmra.mxu3 %vm862_vm0, %v1492_v34  ;;  %v745_v52 = vrot.slane %v744_v19, 4  ;;  %v839_v34 = vld [vmem:[%s4782_s2 + $0x148] sm:$0xff] }
 0x313   :  { %2518 = vmatmul.msk.f32.gmra.mxu0 %vm862_vm0, %v801_v9  ;;  %2582 = vmatmul.msk.f32.gmra.mxu1 %vm862_vm0, %v1460_v27  ;;  %v1498_v9 = vld [vmem:[%s4782_s2 + $0x348] sm:$0xff] }
 0x314   :  { %v746_v27 = vadd.f32 %v745_v52, %v744_v19  ;;  %v1468_v19 = vld [vmem:[%s4782_s2 + $0x258] sm:$0xff]  ;;  %v842_v52 = vld [vmem:[%s4782_s2 + $0x160] sm:$0xff] }
 0x31a   :  { %2551 = vmatmul.msk.f32.gmra.mxu2 %vm862_vm0, %v834_v30  ;;  %2615 = vmatmul.msk.f32.gmra.mxu3 %vm862_vm0, %v1493_v6  ;;  %v807_v30 = vld [vmem:[%s4782_s2 + $0x48] sm:$0xff] }
 0x31b   :  { %2519 = vmatmul.msk.f32.gmra.mxu0 %vm862_vm0, %v802_v42  ;;  %2583 = vmatmul.msk.f32.gmra.mxu1 %vm862_vm0, %v1461_v31  ;;  %v1466_v6 = vld [vmem:[%s4782_s2 + $0x248] sm:$0xff]  ;;  %v747_v42 = vrot.slane %v746_v27, 2 }
 0x322   :  { %2552 = vmatmul.msk.f32.gmra.mxu2 %vm862_vm0, %v835_v22  ;;  %2616 = vmatmul.msk.f32.gmra.mxu3 %vm862_vm0, %v1494_v23 }
 0x323   :  { %2520 = vmatmul.msk.f32.gmra.mxu0 %vm862_vm0, %v803_v43  ;;  %2584 = vmatmul.msk.f32.gmra.mxu1 %vm862_vm0, %v1462_v2  ;;  %v840_v43 = vld [vmem:[%s4782_s2 + $0x150] sm:$0xff] }
 0x324   :  { %v1499_v2 = vld [vmem:[%s4782_s2 + $0x350] sm:$0xff] }
 0x32a   :  { %2553 = vmatmul.msk.f32.gmra.mxu2 %vm862_vm0, %v836_v37  ;;  %2617 = vmatmul.msk.f32.gmra.mxu3 %vm862_vm0, %v1495_v13  ;;  %v748_v37 = vadd.f32 %v747_v42, %v746_v27  ;;  %v808_v13 = vld [vmem:[%s4782_s2 + $0x50] sm:$0xff]  ;;  %v1469_v27 = vld [vmem:[%s4782_s2 + $0x260] sm:$0xff]  ;;  %v811_v42 = vld [vmem:[%s4782_s2 + $0x68] sm:$0xff] }
 0x32b   :  { %2521 = vmatmul.msk.f32.gmra.mxu0 %vm862_vm0, %v804_v14  ;;  %2585 = vmatmul.msk.f32.gmra.mxu1 %vm862_vm0, %v1463_v46  ;;  %v1467_v14 = vld [vmem:[%s4782_s2 + $0x250] sm:$0xff] }
 0x332   :  { %2554 = vmatmul.msk.f32.gmra.mxu2 %vm862_vm0, %v837_v60  ;;  %2618 = vmatmul.msk.f32.gmra.mxu3 %vm862_vm0, %v1496_v10  ;;  %v749_v10 = vrot.slane %v748_v37, 1 }
 0x333   :  { %2522 = vmatmul.msk.f32.gmra.mxu0 %vm862_vm0, %v805_v59  ;;  %2586 = vmatmul.msk.f32.gmra.mxu1 %vm862_vm0, %v1464_v56 }
 0x33a   :  { %2555 = vmatmul.msk.f32.gmra.mxu2 %vm862_vm0, %v838_v63  ;;  %2619 = vmatmul.msk.f32.gmra.mxu3 %vm862_vm0, %v1497_v51  ;;  %v841_v63 = vld [vmem:[%s4782_s2 + $0x158] sm:$0xff] }
 0x33b   :  { %2523 = vmatmul.msk.f32.gmra.mxu0 %vm862_vm0, %v806_v28  ;;  %2587 = vmatmul.msk.f32.gmra.mxu1 %vm862_vm0, %v1465_v44  ;;  %v1500_v51 = vld [vmem:[%s4782_s2 + $0x358] sm:$0xff]  ;;  %v750_v28 = vadd.f32 %v749_v10, %v748_v37  ;;  %v1505_v10 = vld [vmem:[%s4782_s2 + $0x380] sm:$0xff] }
 0x33c   :  { %v809_v44 = vld [vmem:[%s4782_s2 + $0x58] sm:$0xff] }
 0x33d   :  { %v845_v37 = vld [vmem:[%s4782_s2 + $0x178] sm:$0xff] }
 0x342   :  { %2556 = vmatmul.msk.f32.gmra.mxu2 %vm862_vm0, %v839_v34  ;;  %2620 = vmatmul.msk.f32.gmra.mxu3 %vm862_vm0, %v1498_v9  ;;  %v1501_v34 = vld [vmem:[%s4782_s2 + $0x360] sm:$0xff] }
 0x343   :  { %2524 = vmatmul.msk.f32.gmra.mxu0 %vm862_vm0, %v807_v30  ;;  %2588 = vmatmul.msk.f32.gmra.mxu1 %vm862_vm0, %v1466_v6  ;;  %v810_v9 = vld [vmem:[%s4782_s2 + $0x60] sm:$0xff]  ;;  %v843_v30 = vld [vmem:[%s4782_s2 + $0x168] sm:$0xff] }
 0x344   :  { %v1502_v6 = vld [vmem:[%s4782_s2 + $0x368] sm:$0xff] }
 0x345   :  { %v718_v31 = vpop.xlane.xlu2 %717 }
 0x346   :  { %v719_v22 = vrot.slane %v718_v31, 4 }
 0x348   :  { %v720_v23 = vadd.f32 %v719_v22, %v718_v31  ;;  %v1470_v31 = vld [vmem:[%s4782_s2 + $0x268] sm:$0xff]  ;;  %v844_v22 = vld [vmem:[%s4782_s2 + $0x170] sm:$0xff] }
 0x34a   :  { %v721_v46 = vrot.slane %v720_v23, 2  ;;  %2557 = vmatmul.msk.f32.gmra.mxu2 %vm862_vm0, %v840_v43  ;;  %2621 = vmatmul.msk.f32.gmra.mxu3 %vm862_vm0, %v1499_v2  ;;  %v812_v43 = vld [vmem:[%s4782_s2 + $0x70] sm:$0xff] }
 0x34b   :  { %2525 = vmatmul.msk.f32.gmra.mxu0 %vm862_vm0, %v808_v13  ;;  %2589 = vmatmul.msk.f32.gmra.mxu1 %vm862_vm0, %v1467_v14  ;;  %v1471_v2 = vld [vmem:[%s4782_s2 + $0x270] sm:$0xff]  ;;  %v1504_v13 = vld [vmem:[%s4782_s2 + $0x378] sm:$0xff] }
 0x34c   :  { %v722_v60 = vadd.f32 %v721_v46, %v720_v23  ;;  %v1503_v23 = vld [vmem:[%s4782_s2 + $0x370] sm:$0xff]  ;;  %v813_v14 = vld [vmem:[%s4782_s2 + $0x78] sm:$0xff] }
 0x34d   :  { %v1472_v46 = vld [vmem:[%s4782_s2 + $0x278] sm:$0xff] }
 0x34e   :  { %v723_v59 = vrot.slane %v722_v60, 1 }
 0x350   :  { %v724_v56 = vadd.f32 %v723_v59, %v722_v60  ;;  %v846_v60 = vld [vmem:[%s4782_s2 + $0x180] sm:$0xff] }
 0x352   :  { %2648 = vpush %v724_v56  ;;  %2558 = vmatmul.msk.f32.gmra.mxu2 %vm862_vm0, %v841_v63  ;;  %2622 = vmatmul.msk.f32.gmra.mxu3 %vm862_vm0, %v1500_v51  ;;  %v814_v63 = vld [vmem:[%s4782_s2 + $0x80] sm:$0xff] }
 0x353   :  { %2650 = vpush %v750_v28  ;;  %2526 = vmatmul.msk.f32.gmra.mxu0 %vm862_vm0, %v809_v44  ;;  %2590 = vmatmul.msk.f32.gmra.mxu1 %vm862_vm0, %v1468_v19  ;;  %v1473_v51 = vld [vmem:[%s4782_s2 + $0x280] sm:$0xff] }
 0x35a   :  { %2559 = vmatmul.msk.f32.gmra.mxu2 %vm862_vm0, %v842_v52  ;;  %2623 = vmatmul.msk.f32.gmra.mxu3 %vm862_vm0, %v1501_v34 }
 0x35b   :  { %2527 = vmatmul.msk.f32.gmra.mxu0 %vm862_vm0, %v810_v9  ;;  %2591 = vmatmul.msk.f32.gmra.mxu1 %vm862_vm0, %v1469_v27 }
 0x362   :  { %2560 = vmatmul.msk.f32.gmra.mxu2 %vm862_vm0, %v843_v30  ;;  %2624 = vmatmul.msk.f32.gmra.mxu3 %vm862_vm0, %v1502_v6  ;;  %v1506_v30 = vld [vmem:[%s4782_s2 + $0x388] sm:$0xff] }
 0x363   :  { %2528 = vmatmul.msk.f32.gmra.mxu0 %vm862_vm0, %v811_v42  ;;  %2592 = vmatmul.msk.f32.gmra.mxu1 %vm862_vm0, %v1470_v31 }
 0x36a   :  { %2561 = vmatmul.msk.f32.gmra.mxu2 %vm862_vm0, %v844_v22  ;;  %2625 = vmatmul.msk.f32.gmra.mxu3 %vm862_vm0, %v1503_v23  ;;  %v815_v23 = vld [vmem:[%s4782_s2 + $0x88] sm:$0xff] }
 0x36b   :  { %2529 = vmatmul.msk.f32.gmra.mxu0 %vm862_vm0, %v812_v43  ;;  %2593 = vmatmul.msk.f32.gmra.mxu1 %vm862_vm0, %v1471_v2  ;;  %v1474_v43 = vld [vmem:[%s4782_s2 + $0x288] sm:$0xff] }
 0x372   :  { %2562 = vmatmul.msk.f32.gmra.mxu2 %vm862_vm0, %v845_v37  ;;  %2626 = vmatmul.msk.f32.gmra.mxu3 %vm862_vm0, %v1504_v13 }
 0x373   :  { %2530 = vmatmul.msk.f32.gmra.mxu0 %vm862_vm0, %v813_v14  ;;  %2594 = vmatmul.msk.f32.gmra.mxu1 %vm862_vm0, %v1472_v46 }
 0x378   :  { %v1072_v59 = vpop.f32.mrf.mxu0  ;;  %v1730_v56 = vpop.f32.mrf.mxu1 }
 0x379   :  { %v1265_v28 = vmul.f32 %v3647_v38, %v1072_v59  ;;  %v1986_v44 = vmul.f32 %v1730_v56, %v3647_v38 }
 0x37a   :  { %2563 = vmatmul.msk.f32.gmra.mxu2 %vm862_vm0, %v846_v60  ;;  %2627 = vmatmul.msk.f32.gmra.mxu3 %vm862_vm0, %v1505_v10  ;;  %v1507_v60 = vld [vmem:[%s4782_s2 + $0x390] sm:$0xff] }
 0x37b   :  { %v1329_v19 = vsub.f32 %v5065_v47, %v1265_v28  ;;  %v2050_v52 = vsub.f32 %v3087_v48, %v1986_v44  ;;  %2531 = vmatmul.msk.f32.gmra.mxu0 %vm862_vm0, %v814_v63  ;;  %2595 = vmatmul.msk.f32.gmra.mxu1 %vm862_vm0, %v1473_v51  ;;  %v847_v48 = vld [vmem:[%s4782_s2 + $0x188] sm:$0xff]  ;;  %v816_v51 = vld [vmem:[%s4782_s2 + $0x90] sm:$0xff] }
 0x37c   :  { %v1475_v28 = vld [vmem:[%s4782_s2 + $0x290] sm:$0xff] }
 0x37d   :  { %2202 = vst [vmem:[%s4786_s6] sm:$0xff] %v1329_v19  ;;  %v1168_v34 = vpop.f32.mrf.mxu2  ;;  %v1826_v9 = vpop.f32.mrf.mxu3 }
 0x37e   :  { %v1297_v27 = vmul.f32 %v3647_v38, %v1168_v34  ;;  %2330 = vst [vmem:[%s4786_s6 + $0x200] sm:$0xff] %v2050_v52  ;;  %v2018_v47 = vmul.f32 %v1826_v9, %v3647_v38 }
 0x380   :  { %v1361_v6 = vsub.f32 %v5067_v54, %v1297_v27  ;;  %v2082_v42 = vsub.f32 %v3247_v24, %v2018_v47  ;;  %v1075_v31 = vpop.f32.mrf.mxu0  ;;  %v1733_v22 = vpop.f32.mrf.mxu1  ;;  %v1508_v27 = vld [vmem:[%s4782_s2 + $0x398] sm:$0xff] }
 0x381   :  { %v1266_v2 = vmul.f32 %v3647_v38, %v1075_v31  ;;  %v1987_v37 = vmul.f32 %v1733_v22, %v3647_v38  ;;  %v1476_v31 = vld [vmem:[%s4782_s2 + $0x298] sm:$0xff] }
 0x382   :  { %2266 = vst [vmem:[%s4786_s6 + $0x100] sm:$0xff] %v1361_v6  ;;  %2564 = vmatmul.msk.f32.gmra.mxu2 %vm862_vm0, %v847_v48  ;;  %2628 = vmatmul.msk.f32.gmra.mxu3 %vm862_vm0, %v1506_v30 }
 0x383   :  { %s2649_s22 = spop %2648  ;;  %2394 = vst [vmem:[%s4786_s6 + $0x300] sm:$0xff] %v2082_v42  ;;  %v1330_v24 = vsub.f32 %v5061_v35, %v1266_v2  ;;  %v2051_v54 = vsub.f32 %v3092_v16, %v1987_v37  ;;  %2532 = vmatmul.msk.f32.gmra.mxu0 %vm862_vm0, %v815_v23  ;;  %2596 = vmatmul.msk.f32.gmra.mxu1 %vm862_vm0, %v1474_v43  ;;  %v848_v35 = vld [vmem:[%s4782_s2 + $0x190] sm:$0xff]  ;;  %v817_v42 = vld [vmem:[%s4782_s2 + $0x98] sm:$0xff] }
 0x384   :  { %s726_s25 = smul.f32 0.5, %s2649_s22  ;;  %s2651_s26 = spop %2650 }
 0x385   :  { %2187 = sst [smem:[#allocation8 + $0x1]] %s2651_s26  ;;  %2204 = vst [vmem:[%s4786_s6 + $0x8] sm:$0xff] %v1330_v24  ;;  %v1171_v13 = vpop.f32.mrf.mxu2  ;;  %v1829_v14 = vpop.f32.mrf.mxu3  ;;  %v1509_v24 = vld [vmem:[%s4782_s2 + $0x3a0] sm:$0xff] }
 0x386   :  { %2185 = sst [smem:[#allocation8]] %s726_s25  ;;  %v1298_v46 = vmul.f32 %v3647_v38, %v1171_v13  ;;  %2332 = vst [vmem:[%s4786_s6 + $0x208] sm:$0xff] %v2051_v54  ;;  %v2019_v16 = vmul.f32 %v1829_v14, %v3647_v38 }
 0x387   :  { %s2188_s4 = sadd.f32 %s2651_s26, %s726_s25 }
 0x388   :  { %v1362_v10 = vsub.f32 %v5063_v15, %v1298_v46  ;;  %v2083_v59 = vsub.f32 %v3252_v7, %v2019_v16  ;;  %v1078_v56 = vpop.f32.mrf.mxu0  ;;  %v1736_v63 = vpop.f32.mrf.mxu1  ;;  %v818_v16 = vld [vmem:[%s4782_s2 + $0xa0] sm:$0xff] }
 0x389   :  { %2190 = sst [smem:[#allocation8 + $0x2]] %s2188_s4  ;;  %v1267_v44 = vmul.f32 %v3647_v38, %v1078_v56  ;;  %v1988_v19 = vmul.f32 %v1736_v63, %v3647_v38 }
 0x38a   :  { %2268 = vst [vmem:[%s4786_s6 + $0x108] sm:$0xff] %v1362_v10  ;;  %2565 = vmatmul.msk.f32.gmra.mxu2 %vm862_vm0, %v848_v35  ;;  %2629 = vmatmul.msk.f32.gmra.mxu3 %vm862_vm0, %v1507_v60  ;;  %v1477_v35 = vld [vmem:[%s4782_s2 + $0x2a0] sm:$0xff] }
 0x38b   :  { %2396 = vst [vmem:[%s4786_s6 + $0x308] sm:$0xff] %v2083_v59  ;;  %v1331_v7 = vsub.f32 %v5057_v11, %v1267_v44  ;;  %v2052_v15 = vsub.f32 %v3097_v49, %v1988_v19  ;;  %2533 = vmatmul.msk.f32.gmra.mxu0 %vm862_vm0, %v816_v51  ;;  %2597 = vmatmul.msk.f32.gmra.mxu1 %vm862_vm0, %v1475_v28  ;;  %v849_v49 = vld [vmem:[%s4782_s2 + $0x198] sm:$0xff]  ;;  %v1510_v51 = vld [vmem:[%s4782_s2 + $0x3a8] sm:$0xff] }
 0x38d   :  { %2206 = vst [vmem:[%s4786_s6 + $0x10] sm:$0xff] %v1331_v7  ;;  %v1174_v52 = vpop.f32.mrf.mxu2  ;;  %v1832_v34 = vpop.f32.mrf.mxu3 }
 0x38e   :  { %v1299_v9 = vmul.f32 %v3647_v38, %v1174_v52  ;;  %2334 = vst [vmem:[%s4786_s6 + $0x210] sm:$0xff] %v2052_v15  ;;  %v2020_v11 = vmul.f32 %v1832_v34, %v3647_v38  ;;  %v819_v15 = vld [vmem:[%s4782_s2 + $0xa8] sm:$0xff] }
 0x38f   :  { %v1478_v52 = vld [vmem:[%s4782_s2 + $0x2a8] sm:$0xff] }
 0x390   :  { %v1363_v47 = vsub.f32 %v5059_v5, %v1299_v9  ;;  %v2084_v48 = vsub.f32 %v3257_v57, %v2020_v11  ;;  %v1081_v30 = vpop.f32.mrf.mxu0  ;;  %v1739_v6 = vpop.f32.mrf.mxu1 }
 0x391   :  { %v1268_v22 = vmul.f32 %v3647_v38, %v1081_v30  ;;  %v1989_v23 = vmul.f32 %v1739_v6, %v3647_v38 }
 0x392   :  { %2270 = vst [vmem:[%s4786_s6 + $0x110] sm:$0xff] %v1363_v47  ;;  %2566 = vmatmul.msk.f32.gmra.mxu2 %vm862_vm0, %v849_v49  ;;  %2630 = vmatmul.msk.f32.gmra.mxu3 %vm862_vm0, %v1508_v27  ;;  %v1511_v47 = vld [vmem:[%s4782_s2 + $0x3b0] sm:$0xff] }
 0x393   :  { %2398 = vst [vmem:[%s4786_s6 + $0x310] sm:$0xff] %v2084_v48  ;;  %v1332_v57 = vsub.f32 %v5053_v39, %v1268_v22  ;;  %v2053_v5 = vsub.f32 %v3102_v32, %v1989_v23  ;;  %2534 = vmatmul.msk.f32.gmra.mxu0 %vm862_vm0, %v817_v42  ;;  %2598 = vmatmul.msk.f32.gmra.mxu1 %vm862_vm0, %v1476_v31  ;;  %v850_v32 = vld [vmem:[%s4782_s2 + $0x1a0] sm:$0xff]  ;;  %v820_v31 = vld [vmem:[%s4782_s2 + $0xb0] sm:$0xff] }
 0x394   :  { %v1479_v22 = vld [vmem:[%s4782_s2 + $0x2b0] sm:$0xff] }
 0x395   :  { %2208 = vst [vmem:[%s4786_s6 + $0x18] sm:$0xff] %v1332_v57  ;;  %v1177_v43 = vpop.f32.mrf.mxu2  ;;  %v1835_v2 = vpop.f32.mrf.mxu3 }
 0x396   :  { %v1300_v37 = vmul.f32 %v3647_v38, %v1177_v43  ;;  %2336 = vst [vmem:[%s4786_s6 + $0x218] sm:$0xff] %v2053_v5  ;;  %v2021_v39 = vmul.f32 %v1835_v2, %v3647_v38 }
 0x398   :  { %v1364_v54 = vsub.f32 %v5055_v20, %v1300_v37  ;;  %v2085_v13 = vsub.f32 %v3262_v40, %v2021_v39  ;;  %v1084_v14 = vpop.f32.mrf.mxu0  ;;  %v1742_v46 = vpop.f32.mrf.mxu1  ;;  %v1512_v37 = vld [vmem:[%s4782_s2 + $0x3b8] sm:$0xff] }
 0x399   :  { %v1269_v60 = vmul.f32 %v3647_v38, %v1084_v14  ;;  %v1990_v10 = vmul.f32 %v1742_v46, %v3647_v38  ;;  %v1480_v14 = vld [vmem:[%s4782_s2 + $0x2b8] sm:$0xff] }
 0x39a   :  { %2272 = vst [vmem:[%s4786_s6 + $0x118] sm:$0xff] %v1364_v54  ;;  %2567 = vmatmul.msk.f32.gmra.mxu2 %vm862_vm0, %v850_v32  ;;  %2631 = vmatmul.msk.f32.gmra.mxu3 %vm862_vm0, %v1509_v24 }
 0x39b   :  { %2400 = vst [vmem:[%s4786_s6 + $0x318] sm:$0xff] %v2085_v13  ;;  %v1333_v20 = vsub.f32 %v5049_v36, %v1269_v60  ;;  %v2054_v40 = vsub.f32 %v3107_v17, %v1990_v10  ;;  %2535 = vmatmul.msk.f32.gmra.mxu0 %vm862_vm0, %v818_v16  ;;  %2599 = vmatmul.msk.f32.gmra.mxu1 %vm862_vm0, %v1477_v35  ;;  %v851_v17 = vld [vmem:[%s4782_s2 + $0x1a8] sm:$0xff]  ;;  %v821_v13 = vld [vmem:[%s4782_s2 + $0xb8] sm:$0xff] }
 0x39d   :  { %2210 = vst [vmem:[%s4786_s6 + $0x20] sm:$0xff] %v1333_v20  ;;  %v1180_v59 = vpop.f32.mrf.mxu2  ;;  %v1838_v56 = vpop.f32.mrf.mxu3  ;;  %v1513_v20 = vld [vmem:[%s4782_s2 + $0x3c0] sm:$0xff] }
 0x39e   :  { %v1301_v63 = vmul.f32 %v3647_v38, %v1180_v59  ;;  %2338 = vst [vmem:[%s4786_s6 + $0x220] sm:$0xff] %v2054_v40  ;;  %v2022_v36 = vmul.f32 %v1838_v56, %v3647_v38 }
 0x3a0   :  { %v1365_v28 = vsub.f32 %v5051_v3, %v1301_v63  ;;  %v2086_v44 = vsub.f32 %v3267_v25, %v2022_v36  ;;  %v1087_v19 = vpop.f32.mrf.mxu0  ;;  %v1745_v7 = vpop.f32.mrf.mxu1  ;;  %v822_v36 = vld [vmem:[%s4782_s2 + $0xc0] sm:$0xff] }
 0x3a1   :  { %v1270_v34 = vmul.f32 %v3647_v38, %v1087_v19  ;;  %v1991_v9 = vmul.f32 %v1745_v7, %v3647_v38 }
 0x3a2   :  { %2274 = vst [vmem:[%s4786_s6 + $0x120] sm:$0xff] %v1365_v28  ;;  %2568 = vmatmul.msk.f32.gmra.mxu2 %vm862_vm0, %v851_v17  ;;  %2632 = vmatmul.msk.f32.gmra.mxu3 %vm862_vm0, %v1510_v51  ;;  %v1481_v17 = vld [vmem:[%s4782_s2 + $0x2c0] sm:$0xff] }
 0x3a3   :  { %2402 = vst [vmem:[%s4786_s6 + $0x320] sm:$0xff] %v2086_v44  ;;  %v1334_v3 = vsub.f32 %v5045_v61, %v1270_v34  ;;  %v2055_v25 = vsub.f32 %v3112_v0, %v1991_v9  ;;  %2536 = vmatmul.msk.f32.gmra.mxu0 %vm862_vm0, %v819_v15  ;;  %2600 = vmatmul.msk.f32.gmra.mxu1 %vm862_vm0, %v1478_v52  ;;  %v852_v0 = vld [vmem:[%s4782_s2 + $0x1b0] sm:$0xff]  ;;  %v1514_v15 = vld [vmem:[%s4782_s2 + $0x3c8] sm:$0xff] }
 0x3a5   :  { %2212 = vst [vmem:[%s4786_s6 + $0x28] sm:$0xff] %v1334_v3  ;;  %v1183_v11 = vpop.f32.mrf.mxu2  ;;  %v1841_v49 = vpop.f32.mrf.mxu3 }
 0x3a6   :  { %v1302_v27 = vmul.f32 %v3647_v38, %v1183_v11  ;;  %2340 = vst [vmem:[%s4786_s6 + $0x228] sm:$0xff] %v2055_v25  ;;  %v2023_v61 = vmul.f32 %v1841_v49, %v3647_v38  ;;  %v823_v25 = vld [vmem:[%s4782_s2 + $0xc8] sm:$0xff] }
 0x3a7   :  { %v1482_v11 = vld [vmem:[%s4782_s2 + $0x2c8] sm:$0xff] }
 0x3a8   :  { %v1366_v48 = vsub.f32 %v5047_v53, %v1302_v27  ;;  %v2087_v30 = vsub.f32 %v3272_v8, %v2023_v61  ;;  %v1090_v6 = vpop.f32.mrf.mxu0  ;;  %v1748_v42 = vpop.f32.mrf.mxu1 }
 0x3a9   :  { %v1271_v23 = vmul.f32 %v3647_v38, %v1090_v6  ;;  %v1992_v57 = vmul.f32 %v1748_v42, %v3647_v38  ;;  %v5072_v42 = vld [vmem:[#allocation101_spill] sm:$0xff] }
 0x3aa   :  { %2276 = vst [vmem:[%s4786_s6 + $0x128] sm:$0xff] %v1366_v48  ;;  %2569 = vmatmul.msk.f32.gmra.mxu2 %vm862_vm0, %v852_v0  ;;  %2633 = vmatmul.msk.f32.gmra.mxu3 %vm862_vm0, %v1511_v47  ;;  %v1515_v48 = vld [vmem:[%s4782_s2 + $0x3d0] sm:$0xff] }
 0x3ab   :  { %2404 = vst [vmem:[%s4786_s6 + $0x328] sm:$0xff] %v2087_v30  ;;  %v1335_v8 = vsub.f32 %v5041_v12, %v1271_v23  ;;  %v2056_v53 = vsub.f32 %v3117_v50, %v1992_v57  ;;  %2537 = vmatmul.msk.f32.gmra.mxu0 %vm862_vm0, %v820_v31  ;;  %2601 = vmatmul.msk.f32.gmra.mxu1 %vm862_vm0, %v1479_v22  ;;  %v853_v50 = vld [vmem:[%s4782_s2 + $0x1b8] sm:$0xff]  ;;  %v5071_v30 = vld [vmem:[#allocation56_spill] sm:$0xff] }
 0x3ac   :  { %v824_v57 = vld [vmem:[%s4782_s2 + $0xd0] sm:$0xff] }
 0x3ad   :  { %2214 = vst [vmem:[%s4786_s6 + $0x30] sm:$0xff] %v1335_v8  ;;  %v1186_v5 = vpop.f32.mrf.mxu2  ;;  %v1844_v43 = vpop.f32.mrf.mxu3  ;;  %v1483_v8 = vld [vmem:[%s4782_s2 + $0x2d0] sm:$0xff] }
 0x3ae   :  { %v1303_v2 = vmul.f32 %v3647_v38, %v1186_v5  ;;  %2342 = vst [vmem:[%s4786_s6 + $0x230] sm:$0xff] %v2056_v53  ;;  %v2024_v12 = vmul.f32 %v1844_v43, %v3647_v38  ;;  %v5073_v43 = vld [vmem:[#allocation25_spill] sm:$0xff] }
 0x3b0   :  { %v1367_v39 = vsub.f32 %v5043_v62, %v1303_v2  ;;  %v2088_v32 = vsub.f32 %v3277_v58, %v2024_v12  ;;  %v1093_v24 = vpop.f32.mrf.mxu0  ;;  %v1751_v54 = vpop.f32.mrf.mxu1  ;;  %v5074_v12 = vld [vmem:[#allocation79_spill] sm:$0xff] }
 0x3b1   :  { %v1272_v46 = vmul.f32 %v3647_v38, %v1093_v24  ;;  %v1993_v16 = vmul.f32 %v1751_v54, %v3647_v38  ;;  %v857_v54 = vld [vmem:[%s4782_s2 + $0x1d8] sm:$0xff] }
 0x3b2   :  { %2278 = vst [vmem:[%s4786_s6 + $0x130] sm:$0xff] %v1367_v39  ;;  %2570 = vmatmul.msk.f32.gmra.mxu2 %vm862_vm0, %v853_v50  ;;  %2634 = vmatmul.msk.f32.gmra.mxu3 %vm862_vm0, %v1512_v37 }
 0x3b3   :  { %2406 = vst [vmem:[%s4786_s6 + $0x330] sm:$0xff] %v2088_v32  ;;  %v1336_v58 = vsub.f32 %v5037_v29, %v1272_v46  ;;  %v2057_v62 = vsub.f32 %v3122_v33, %v1993_v16  ;;  %2538 = vmatmul.msk.f32.gmra.mxu0 %vm862_vm0, %v821_v13  ;;  %2602 = vmatmul.msk.f32.gmra.mxu1 %vm862_vm0, %v1480_v14  ;;  %v854_v33 = vld [vmem:[%s4782_s2 + $0x1c0] sm:$0xff]  ;;  %v1516_v13 = vld [vmem:[%s4782_s2 + $0x3d8] sm:$0xff] }
 0x3b4   :  { %v5075_v14 = vld [vmem:[#allocation57_spill] sm:$0xff]  ;;  %v5076_v16 = vld [vmem:[#allocation102_spill] sm:$0xff] }
 0x3b5   :  { %2216 = vst [vmem:[%s4786_s6 + $0x38] sm:$0xff] %v1336_v58  ;;  %v1189_v35 = vpop.f32.mrf.mxu2  ;;  %v1847_v60 = vpop.f32.mrf.mxu3 }
 0x3b6   :  { %v1304_v10 = vmul.f32 %v3647_v38, %v1189_v35  ;;  %2344 = vst [vmem:[%s4786_s6 + $0x238] sm:$0xff] %v2057_v62  ;;  %v2025_v29 = vmul.f32 %v1847_v60, %v3647_v38  ;;  %v825_v60 = vld [vmem:[%s4782_s2 + $0xd8] sm:$0xff] }
 0x3b8   :  { %v1368_v40 = vsub.f32 %v5039_v21, %v1304_v10  ;;  %v2089_v59 = vsub.f32 %v3282_v41, %v2025_v29  ;;  %v1096_v56 = vpop.f32.mrf.mxu0  ;;  %v1754_v63 = vpop.f32.mrf.mxu1  ;;  %v1484_v10 = vld [vmem:[%s4782_s2 + $0x2d8] sm:$0xff] }
 0x3b9   :  { %v1273_v51 = vmul.f32 %v3647_v38, %v1096_v56  ;;  %v1994_v28 = vmul.f32 %v1754_v63, %v3647_v38 }
 0x3ba   :  { %2280 = vst [vmem:[%s4786_s6 + $0x138] sm:$0xff] %v1368_v40  ;;  %2571 = vmatmul.msk.f32.gmra.mxu2 %vm862_vm0, %v854_v33  ;;  %2635 = vmatmul.msk.f32.gmra.mxu3 %vm862_vm0, %v1513_v20  ;;  %v5077_v20 = vld [vmem:[#allocation26_spill] sm:$0xff] }
 0x3bb   :  { %2408 = vst [vmem:[%s4786_s6 + $0x338] sm:$0xff] %v2089_v59  ;;  %v1337_v21 = vsub.f32 %v5033_v45, %v1273_v51  ;;  %v2058_v41 = vsub.f32 %v3127_v18, %v1994_v28  ;;  %2539 = vmatmul.msk.f32.gmra.mxu0 %vm862_vm0, %v822_v36  ;;  %2603 = vmatmul.msk.f32.gmra.mxu1 %vm862_vm0, %v1481_v17  ;;  %v855_v18 = vld [vmem:[%s4782_s2 + $0x1c8] sm:$0xff]  ;;  %v858_v28 = vld [vmem:[%s4782_s2 + $0x1e0] sm:$0xff] }
 0x3bc   :  { %v5078_v59 = vld [vmem:[#allocation80_spill] sm:$0xff] }
 0x3bd   :  { %2218 = vst [vmem:[%s4786_s6 + $0x40] sm:$0xff] %v1337_v21  ;;  %v1192_v44 = vpop.f32.mrf.mxu2  ;;  %v1850_v19 = vpop.f32.mrf.mxu3  ;;  %v1517_v21 = vld [vmem:[%s4782_s2 + $0x3e0] sm:$0xff] }
 0x3be   :  { %v1305_v7 = vmul.f32 %v3647_v38, %v1192_v44  ;;  %2346 = vst [vmem:[%s4786_s6 + $0x240] sm:$0xff] %v2058_v41  ;;  %v2026_v45 = vmul.f32 %v1850_v19, %v3647_v38  ;;  %v5079_v41 = vld [vmem:[#allocation58_spill] sm:$0xff]  ;;  %v5080_v19 = vld [vmem:[#allocation103_spill] sm:$0xff] }
 0x3c0   :  { %v1369_v52 = vsub.f32 %v5035_v4, %v1305_v7  ;;  %v2090_v34 = vsub.f32 %v3287_v26, %v2026_v45  ;;  %v1099_v9 = vpop.f32.mrf.mxu0  ;;  %v1757_v3 = vpop.f32.mrf.mxu1 }
 0x3c1   :  { %v1274_v49 = vmul.f32 %v3647_v38, %v1099_v9  ;;  %v1995_v27 = vmul.f32 %v1757_v3, %v3647_v38  ;;  %v5081_v3 = vld [vmem:[#allocation27_spill] sm:$0xff] }
 0x3c2   :  { %2282 = vst [vmem:[%s4786_s6 + $0x140] sm:$0xff] %v1369_v52  ;;  %2572 = vmatmul.msk.f32.gmra.mxu2 %vm862_vm0, %v855_v18  ;;  %2636 = vmatmul.msk.f32.gmra.mxu3 %vm862_vm0, %v1514_v15  ;;  %v826_v15 = vld [vmem:[%s4782_s2 + $0xe0] sm:$0xff] }
 0x3c3   :  { %2410 = vst [vmem:[%s4786_s6 + $0x340] sm:$0xff] %v2090_v34  ;;  %v1338_v4 = vsub.f32 %v5029_v55, %v1274_v49  ;;  %v2059_v26 = vsub.f32 %v3132_v1, %v1995_v27  ;;  %2540 = vmatmul.msk.f32.gmra.mxu0 %vm862_vm0, %v823_v25  ;;  %2604 = vmatmul.msk.f32.gmra.mxu1 %vm862_vm0, %v1482_v11  ;;  %v856_v1 = vld [vmem:[%s4782_s2 + $0x1d0] sm:$0xff]  ;;  %v1485_v52 = vld [vmem:[%s4782_s2 + $0x2e0] sm:$0xff] }
 0x3c4   :  { %v5082_v11 = vld [vmem:[#allocation81_spill] sm:$0xff] }
 0x3c5   :  { %2220 = vst [vmem:[%s4786_s6 + $0x48] sm:$0xff] %v1338_v4  ;;  %v1195_v61 = vpop.f32.mrf.mxu2  ;;  %v1853_v0 = vpop.f32.mrf.mxu3 }
 0x3c6   :  { %v1306_v47 = vmul.f32 %v3647_v38, %v1195_v61  ;;  %2348 = vst [vmem:[%s4786_s6 + $0x248] sm:$0xff] %v2059_v26  ;;  %v2027_v55 = vmul.f32 %v1853_v0, %v3647_v38  ;;  %v859_v0 = vld [vmem:[%s4782_s2 + $0x1e8] sm:$0xff] }
 0x3c8   :  { %v1370_v6 = vsub.f32 %v5071_v30, %v1306_v47  ;;  %v2091_v31 = vsub.f32 %v5072_v42, %v2027_v55  ;;  %v1102_v22 = vpop.f32.mrf.mxu0  ;;  %v1760_v23 = vpop.f32.mrf.mxu1  ;;  %v1518_v47 = vld [vmem:[%s4782_s2 + $0x3e8] sm:$0xff] }
 0x3c9   :  { %v1275_v53 = vmul.f32 %v3647_v38, %v1102_v22  ;;  %v1996_v5 = vmul.f32 %v1760_v23, %v3647_v38  ;;  %v5083_v55 = vld [vmem:[#allocation59_spill] sm:$0xff] }
 0x3ca   :  { %2284 = vst [vmem:[%s4786_s6 + $0x148] sm:$0xff] %v1370_v6  ;;  %2573 = vmatmul.msk.f32.gmra.mxu2 %vm862_vm0, %v856_v1  ;;  %2637 = vmatmul.msk.f32.gmra.mxu3 %vm862_vm0, %v1515_v48  ;;  %v5084_v48 = vld [vmem:[#allocation104_spill] sm:$0xff] }
 0x3cb   :  { %2412 = vst [vmem:[%s4786_s6 + $0x348] sm:$0xff] %v2091_v31  ;;  %v1339_v2 = vsub.f32 %v5073_v43, %v1275_v53  ;;  %v2060_v50 = vsub.f32 %v5074_v12, %v1996_v5  ;;  %2541 = vmatmul.msk.f32.gmra.mxu0 %vm862_vm0, %v824_v57  ;;  %2605 = vmatmul.msk.f32.gmra.mxu1 %vm862_vm0, %v1483_v8  ;;  %v827_v31 = vld [vmem:[%s4782_s2 + $0xe8] sm:$0xff]  ;;  %v5086_v5 = vld [vmem:[#allocation82_spill] sm:$0xff] }
 0x3cc   :  { %v1486_v22 = vld [vmem:[%s4782_s2 + $0x2e8] sm:$0xff] }
 0x3cd   :  { %2222 = vst [vmem:[%s4786_s6 + $0x50] sm:$0xff] %v1339_v2  ;;  %v1198_v37 = vpop.f32.mrf.mxu2  ;;  %v1856_v39 = vpop.f32.mrf.mxu3  ;;  %v5085_v8 = vld [vmem:[#allocation28_spill] sm:$0xff] }
 0x3ce   :  { %v1307_v32 = vmul.f32 %v3647_v38, %v1198_v37  ;;  %2350 = vst [vmem:[%s4786_s6 + $0x250] sm:$0xff] %v2060_v50  ;;  %v2028_v24 = vmul.f32 %v1856_v39, %v3647_v38  ;;  %v860_v39 = vld [vmem:[%s4782_s2 + $0x1f0] sm:$0xff] }
 0x3d0   :  { %v1371_v46 = vsub.f32 %v5075_v14, %v1307_v32  ;;  %v2092_v58 = vsub.f32 %v5076_v16, %v2028_v24  ;;  %v1105_v62 = vpop.f32.mrf.mxu0  ;;  %v1763_v35 = vpop.f32.mrf.mxu1  ;;  %v1519_v32 = vld [vmem:[%s4782_s2 + $0x3f0] sm:$0xff] }
 0x3d1   :  { %v1276_v29 = vmul.f32 %v3647_v38, %v1105_v62  ;;  %v1997_v33 = vmul.f32 %v1763_v35, %v3647_v38  ;;  %v5087_v24 = vld [vmem:[#allocation60_spill] sm:$0xff] }
 0x3d2   :  { %2286 = vst [vmem:[%s4786_s6 + $0x150] sm:$0xff] %v1371_v46  ;;  %2574 = vmatmul.msk.f32.gmra.mxu2 %vm862_vm0, %v857_v54  ;;  %2638 = vmatmul.msk.f32.gmra.mxu3 %vm862_vm0, %v1516_v13  ;;  %v5088_v13 = vld [vmem:[#allocation105_spill] sm:$0xff] }
 0x3d3   :  { %2414 = vst [vmem:[%s4786_s6 + $0x350] sm:$0xff] %v2092_v58  ;;  %v1340_v40 = vsub.f32 %v5077_v20, %v1276_v29  ;;  %v2061_v56 = vsub.f32 %v5078_v59, %v1997_v33  ;;  %2542 = vmatmul.msk.f32.gmra.mxu0 %vm862_vm0, %v825_v60  ;;  %2606 = vmatmul.msk.f32.gmra.mxu1 %vm862_vm0, %v1484_v10  ;;  %v828_v58 = vld [vmem:[%s4782_s2 + $0xf0] sm:$0xff]  ;;  %v5090_v33 = vld [vmem:[#allocation83_spill] sm:$0xff] }
 0x3d4   :  { %v1487_v62 = vld [vmem:[%s4782_s2 + $0x2f0] sm:$0xff] }
 0x3d5   :  { %2224 = vst [vmem:[%s4786_s6 + $0x58] sm:$0xff] %v1340_v40  ;;  %v1201_v63 = vpop.f32.mrf.mxu2  ;;  %v1859_v36 = vpop.f32.mrf.mxu3  ;;  %v5089_v10 = vld [vmem:[#allocation29_spill] sm:$0xff] }
 0x3d6   :  { %v1308_v17 = vmul.f32 %v3647_v38, %v1201_v63  ;;  %2352 = vst [vmem:[%s4786_s6 + $0x258] sm:$0xff] %v2061_v56  ;;  %v2029_v51 = vmul.f32 %v1859_v36, %v3647_v38  ;;  %v861_v36 = vld [vmem:[%s4782_s2 + $0x1f8] sm:$0xff] }
 0x3d8   :  { %v1372_v44 = vsub.f32 %v5079_v41, %v1308_v17  ;;  %v2093_v7 = vsub.f32 %v5080_v19, %v2029_v51  ;;  %v1108_v45 = vpop.f32.mrf.mxu0  ;;  %v1766_v18 = vpop.f32.mrf.mxu1  ;;  %v1520_v17 = vld [vmem:[%s4782_s2 + $0x3f8] sm:$0xff] }
 0x3d9   :  { %v1277_v34 = vmul.f32 %v3647_v38, %v1108_v45  ;;  %v1998_v9 = vmul.f32 %v1766_v18, %v3647_v38  ;;  %v5091_v51 = vld [vmem:[#allocation61_spill] sm:$0xff] }
 0x3da   :  { %2288 = vst [vmem:[%s4786_s6 + $0x158] sm:$0xff] %v1372_v44  ;;  %2575 = vmatmul.msk.f32.gmra.mxu2 %vm862_vm0, %v858_v28  ;;  %2639 = vmatmul.msk.f32.gmra.mxu3 %vm862_vm0, %v1517_v21  ;;  %v5092_v21 = vld [vmem:[#allocation106_spill] sm:$0xff] }
 0x3db   :  { %2416 = vst [vmem:[%s4786_s6 + $0x358] sm:$0xff] %v2093_v7  ;;  %v1341_v25 = vsub.f32 %v5081_v3, %v1277_v34  ;;  %v2062_v49 = vsub.f32 %v5082_v11, %v1998_v9  ;;  %2543 = vmatmul.msk.f32.gmra.mxu0 %vm862_vm0, %v826_v15  ;;  %2607 = vmatmul.msk.f32.gmra.mxu1 %vm862_vm0, %v1485_v52  ;;  %v829_v7 = vld [vmem:[%s4782_s2 + $0xf8] sm:$0xff]  ;;  %v5094_v9 = vld [vmem:[#allocation84_spill] sm:$0xff] }
 0x3dc   :  { %v1488_v45 = vld [vmem:[%s4782_s2 + $0x2f8] sm:$0xff] }
 0x3dd   :  { %2226 = vst [vmem:[%s4786_s6 + $0x60] sm:$0xff] %v1341_v25  ;;  %v1204_v27 = vpop.f32.mrf.mxu2  ;;  %v1862_v4 = vpop.f32.mrf.mxu3  ;;  %v5093_v52 = vld [vmem:[#allocation30_spill] sm:$0xff] }
 0x3de   :  { %v1309_v26 = vmul.f32 %v3647_v38, %v1204_v27  ;;  %2354 = vst [vmem:[%s4786_s6 + $0x260] sm:$0xff] %v2062_v49  ;;  %v2030_v61 = vmul.f32 %v1862_v4, %v3647_v38  ;;  %v5095_v4 = vld [vmem:[#allocation62_spill] sm:$0xff] }
 0x3e0   :  { %v1373_v1 = vsub.f32 %v5083_v55, %v1309_v26  ;;  %v2094_v30 = vsub.f32 %v5084_v48, %v2030_v61  ;;  %v1111_v6 = vpop.f32.mrf.mxu0  ;;  %v1769_v42 = vpop.f32.mrf.mxu1  ;;  %v5096_v61 = vld [vmem:[#allocation107_spill] sm:$0xff] }
 0x3e1   :  { %v1278_v23 = vmul.f32 %v3647_v38, %v1111_v6  ;;  %v1999_v57 = vmul.f32 %v1769_v42, %v3647_v38  ;;  %v5098_v42 = vld [vmem:[#allocation85_spill] sm:$0xff] }
 0x3e2   :  { %2290 = vst [vmem:[%s4786_s6 + $0x160] sm:$0xff] %v1373_v1  ;;  %2576 = vmatmul.msk.f32.gmra.mxu2 %vm862_vm0, %v859_v0  ;;  %2640 = vmatmul.msk.f32.gmra.mxu3 %vm862_vm0, %v1518_v47 }
 0x3e3   :  { %2418 = vst [vmem:[%s4786_s6 + $0x360] sm:$0xff] %v2094_v30  ;;  %v1342_v53 = vsub.f32 %v5085_v8, %v1278_v23  ;;  %v2063_v43 = vsub.f32 %v5086_v5, %v1999_v57  ;;  %2544 = vmatmul.msk.f32.gmra.mxu0 %vm862_vm0, %v827_v31  ;;  %2608 = vmatmul.msk.f32.gmra.mxu1 %vm862_vm0, %v1486_v22  ;;  %v5097_v30 = vld [vmem:[#allocation31_spill] sm:$0xff] }
 0x3e5   :  { %2228 = vst [vmem:[%s4786_s6 + $0x68] sm:$0xff] %v1342_v53  ;;  %v1207_v2 = vpop.f32.mrf.mxu2  ;;  %v1865_v12 = vpop.f32.mrf.mxu3  ;;  %v5099_v53 = vld [vmem:[#allocation63_spill] sm:$0xff] }
 0x3e6   :  { %v1310_v50 = vmul.f32 %v3647_v38, %v1207_v2  ;;  %2356 = vst [vmem:[%s4786_s6 + $0x268] sm:$0xff] %v2063_v43  ;;  %v2031_v37 = vmul.f32 %v1865_v12, %v3647_v38  ;;  %v5100_v43 = vld [vmem:[#allocation108_spill] sm:$0xff] }
 0x3e8   :  { %v1374_v54 = vsub.f32 %v5087_v24, %v1310_v50  ;;  %v2095_v14 = vsub.f32 %v5088_v13, %v2031_v37  ;;  %v1114_v46 = vpop.f32.mrf.mxu0  ;;  %v1772_v16 = vpop.f32.mrf.mxu1 }
 0x3e9   :  { %v1279_v35 = vmul.f32 %v3647_v38, %v1114_v46  ;;  %v2000_v60 = vmul.f32 %v1772_v16, %v3647_v38 }
 0x3ea   :  { %2292 = vst [vmem:[%s4786_s6 + $0x168] sm:$0xff] %v1374_v54  ;;  %2577 = vmatmul.msk.f32.gmra.mxu2 %vm862_vm0, %v860_v39  ;;  %2641 = vmatmul.msk.f32.gmra.mxu3 %vm862_vm0, %v1519_v32  ;;  %v5101_v32 = vld [vmem:[#allocation32_spill] sm:$0xff]  ;;  %v5102_v54 = vld [vmem:[#allocation86_spill] sm:$0xff] }
 0x3eb   :  { %2420 = vst [vmem:[%s4786_s6 + $0x368] sm:$0xff] %v2095_v14  ;;  %v1343_v29 = vsub.f32 %v5089_v10, %v1279_v35  ;;  %v2064_v20 = vsub.f32 %v5090_v33, %v2000_v60  ;;  %2545 = vmatmul.msk.f32.gmra.mxu0 %vm862_vm0, %v828_v58  ;;  %2609 = vmatmul.msk.f32.gmra.mxu1 %vm862_vm0, %v1487_v62  ;;  %v5103_v62 = vld [vmem:[#allocation64_spill] sm:$0xff]  ;;  %v5104_v60 = vld [vmem:[#allocation109_spill] sm:$0xff] }
 0x3ed   :  { %2230 = vst [vmem:[%s4786_s6 + $0x70] sm:$0xff] %v1343_v29  ;;  %v1210_v40 = vpop.f32.mrf.mxu2  ;;  %v1868_v59 = vpop.f32.mrf.mxu3 }
 0x3ee   :  { %v1311_v56 = vmul.f32 %v3647_v38, %v1210_v40  ;;  %2358 = vst [vmem:[%s4786_s6 + $0x270] sm:$0xff] %v2064_v20  ;;  %v2032_v63 = vmul.f32 %v1868_v59, %v3647_v38  ;;  %v5105_v59 = vld [vmem:[#allocation33_spill] sm:$0xff] }
 0x3f0   :  { %v1375_v28 = vsub.f32 %v5091_v51, %v1311_v56  ;;  %v2096_v41 = vsub.f32 %v5092_v21, %v2032_v63  ;;  %v1117_v44 = vpop.f32.mrf.mxu0  ;;  %v1775_v19 = vpop.f32.mrf.mxu1  ;;  %v5106_v63 = vld [vmem:[#allocation87_spill] sm:$0xff] }
 0x3f1   :  { %v1280_v18 = vmul.f32 %v3647_v38, %v1117_v44  ;;  %v2001_v15 = vmul.f32 %v1775_v19, %v3647_v38  ;;  %v5108_v19 = vld [vmem:[#allocation110_spill] sm:$0xff] }
 0x3f2   :  { %2294 = vst [vmem:[%s4786_s6 + $0x170] sm:$0xff] %v1375_v28  ;;  %2578 = vmatmul.msk.f32.gmra.mxu2 %vm862_vm0, %v861_v36  ;;  %2642 = vmatmul.msk.f32.gmra.mxu3 %vm862_vm0, %v1520_v17 }
 0x3f3   :  { %2422 = vst [vmem:[%s4786_s6 + $0x370] sm:$0xff] %v2096_v41  ;;  %v1344_v34 = vsub.f32 %v5093_v52, %v1280_v18  ;;  %v2065_v3 = vsub.f32 %v5094_v9, %v2001_v15  ;;  %2546 = vmatmul.msk.f32.gmra.mxu0 %vm862_vm0, %v829_v7  ;;  %2610 = vmatmul.msk.f32.gmra.mxu1 %vm862_vm0, %v1488_v45  ;;  %v5107_v41 = vld [vmem:[#allocation65_spill] sm:$0xff] }
 0x3f5   :  { %2232 = vst [vmem:[%s4786_s6 + $0x78] sm:$0xff] %v1344_v34  ;;  %v1213_v25 = vpop.f32.mrf.mxu2  ;;  %v1871_v11 = vpop.f32.mrf.mxu3  ;;  %v5109_v34 = vld [vmem:[#allocation34_spill] sm:$0xff] }
 0x3f6   :  { %v1312_v49 = vmul.f32 %v3647_v38, %v1213_v25  ;;  %2360 = vst [vmem:[%s4786_s6 + $0x278] sm:$0xff] %v2065_v3  ;;  %v2033_v27 = vmul.f32 %v1871_v11, %v3647_v38  ;;  %v5110_v3 = vld [vmem:[#allocation88_spill] sm:$0xff] }
 0x3f8   :  { %v1376_v26 = vsub.f32 %v5095_v4, %v1312_v49  ;;  %v2097_v0 = vsub.f32 %v5096_v61, %v2033_v27  ;;  %v1120_v47 = vpop.f32.mrf.mxu0  ;;  %v1778_v55 = vpop.f32.mrf.mxu1 }
 0x3f9   :  { %v1281_v1 = vmul.f32 %v3647_v38, %v1120_v47  ;;  %v2002_v48 = vmul.f32 %v1778_v55, %v3647_v38 }
 0x3fa   :  { %2296 = vst [vmem:[%s4786_s6 + $0x178] sm:$0xff] %v1376_v26  ;;  %v5111_v26 = vld [vmem:[#allocation66_spill] sm:$0xff] }
 0x3fb   :  { %2424 = vst [vmem:[%s4786_s6 + $0x378] sm:$0xff] %v2097_v0  ;;  %v1345_v6 = vsub.f32 %v5097_v30, %v1281_v1  ;;  %v2066_v31 = vsub.f32 %v5098_v42, %v2002_v48  ;;  %v5112_v0 = vld [vmem:[#allocation111_spill] sm:$0xff] }
 0x3fd   :  { %2234 = vst [vmem:[%s4786_s6 + $0x80] sm:$0xff] %v1345_v6  ;;  %v1216_v22 = vpop.f32.mrf.mxu2  ;;  %v1874_v23 = vpop.f32.mrf.mxu3  ;;  %v5113_v6 = vld [vmem:[#allocation35_spill] sm:$0xff] }
 0x3fe   :  { %v1313_v57 = vmul.f32 %v3647_v38, %v1216_v22  ;;  %2362 = vst [vmem:[%s4786_s6 + $0x280] sm:$0xff] %v2066_v31  ;;  %v2034_v8 = vmul.f32 %v1874_v23, %v3647_v38  ;;  %v5114_v31 = vld [vmem:[#allocation89_spill] sm:$0xff] }
 0x400   :  { %v1377_v5 = vsub.f32 %v5099_v53, %v1313_v57  ;;  %v2098_v2 = vsub.f32 %v5100_v43, %v2034_v8  ;;  %v1123_v12 = vpop.f32.mrf.mxu0  ;;  %v1781_v50 = vpop.f32.mrf.mxu1 }
 0x401   :  { %v1282_v37 = vmul.f32 %v3647_v38, %v1123_v12  ;;  %v2003_v39 = vmul.f32 %v1781_v50, %v3647_v38 }
 0x402   :  { %2298 = vst [vmem:[%s4786_s6 + $0x180] sm:$0xff] %v1377_v5  ;;  %v5115_v5 = vld [vmem:[#allocation67_spill] sm:$0xff] }
 0x403   :  { %2426 = vst [vmem:[%s4786_s6 + $0x380] sm:$0xff] %v2098_v2  ;;  %v1346_v24 = vsub.f32 %v5101_v32, %v1282_v37  ;;  %v2067_v13 = vsub.f32 %v5102_v54, %v2003_v39  ;;  %v5116_v2 = vld [vmem:[#allocation112_spill] sm:$0xff] }
 0x405   :  { %2236 = vst [vmem:[%s4786_s6 + $0x88] sm:$0xff] %v1346_v24  ;;  %v1219_v14 = vpop.f32.mrf.mxu2  ;;  %v1877_v46 = vpop.f32.mrf.mxu3  ;;  %v5117_v24 = vld [vmem:[#allocation36_spill] sm:$0xff] }
 0x406   :  { %v1314_v16 = vmul.f32 %v3647_v38, %v1219_v14  ;;  %2364 = vst [vmem:[%s4786_s6 + $0x288] sm:$0xff] %v2067_v13  ;;  %v2035_v58 = vmul.f32 %v1877_v46, %v3647_v38  ;;  %v5118_v13 = vld [vmem:[#allocation90_spill] sm:$0xff] }
 0x408   :  { %v1378_v35 = vsub.f32 %v5103_v62, %v1314_v16  ;;  %v2099_v10 = vsub.f32 %v5104_v60, %v2035_v58  ;;  %v1126_v29 = vpop.f32.mrf.mxu0  ;;  %v1784_v33 = vpop.f32.mrf.mxu1 }
 0x409   :  { %v1283_v20 = vmul.f32 %v3647_v38, %v1126_v29  ;;  %v2004_v40 = vmul.f32 %v1784_v33, %v3647_v38 }
 0x40a   :  { %2300 = vst [vmem:[%s4786_s6 + $0x188] sm:$0xff] %v1378_v35  ;;  %v5119_v35 = vld [vmem:[#allocation68_spill] sm:$0xff] }
 0x40b   :  { %2428 = vst [vmem:[%s4786_s6 + $0x388] sm:$0xff] %v2099_v10  ;;  %v1347_v56 = vsub.f32 %v5105_v59, %v1283_v20  ;;  %v2068_v36 = vsub.f32 %v5106_v63, %v2004_v40  ;;  %v5120_v10 = vld [vmem:[#allocation113_spill] sm:$0xff] }
 0x40d   :  { %2238 = vst [vmem:[%s4786_s6 + $0x90] sm:$0xff] %v1347_v56  ;;  %v1222_v17 = vpop.f32.mrf.mxu2  ;;  %v1880_v51 = vpop.f32.mrf.mxu3  ;;  %v5121_v56 = vld [vmem:[#allocation37_spill] sm:$0xff] }
 0x40e   :  { %v1315_v28 = vmul.f32 %v3647_v38, %v1222_v17  ;;  %2366 = vst [vmem:[%s4786_s6 + $0x290] sm:$0xff] %v2068_v36  ;;  %v2036_v21 = vmul.f32 %v1880_v51, %v3647_v38  ;;  %v5122_v36 = vld [vmem:[#allocation91_spill] sm:$0xff] }
 0x410   :  { %v1379_v44 = vsub.f32 %v5107_v41, %v1315_v28  ;;  %v2100_v7 = vsub.f32 %v5108_v19, %v2036_v21  ;;  %v1129_v45 = vpop.f32.mrf.mxu0  ;;  %v1787_v18 = vpop.f32.mrf.mxu1 }
 0x411   :  { %v1284_v15 = vmul.f32 %v3647_v38, %v1129_v45  ;;  %v2005_v52 = vmul.f32 %v1787_v18, %v3647_v38 }
 0x412   :  { %2302 = vst [vmem:[%s4786_s6 + $0x190] sm:$0xff] %v1379_v44  ;;  %v5123_v44 = vld [vmem:[#allocation69_spill] sm:$0xff] }
 0x413   :  { %2430 = vst [vmem:[%s4786_s6 + $0x390] sm:$0xff] %v2100_v7  ;;  %v1348_v9 = vsub.f32 %v5109_v34, %v1284_v15  ;;  %v2069_v25 = vsub.f32 %v5110_v3, %v2005_v52  ;;  %v5124_v7 = vld [vmem:[#allocation114_spill] sm:$0xff] }
 0x415   :  { %2240 = vst [vmem:[%s4786_s6 + $0x98] sm:$0xff] %v1348_v9  ;;  %v1225_v11 = vpop.f32.mrf.mxu2  ;;  %v1883_v49 = vpop.f32.mrf.mxu3  ;;  %v5125_v9 = vld [vmem:[#allocation38_spill] sm:$0xff] }
 0x416   :  { %v1316_v27 = vmul.f32 %v3647_v38, %v1225_v11  ;;  %2368 = vst [vmem:[%s4786_s6 + $0x298] sm:$0xff] %v2069_v25  ;;  %v2037_v4 = vmul.f32 %v1883_v49, %v3647_v38  ;;  %v5126_v25 = vld [vmem:[#allocation92_spill] sm:$0xff] }
 0x418   :  { %v1380_v61 = vsub.f32 %v5111_v26, %v1316_v27  ;;  %v2101_v47 = vsub.f32 %v5112_v0, %v2037_v4  ;;  %v1132_v55 = vpop.f32.mrf.mxu0  ;;  %v1790_v1 = vpop.f32.mrf.mxu1 }
 0x419   :  { %v1285_v48 = vmul.f32 %v3647_v38, %v1132_v55  ;;  %v2006_v30 = vmul.f32 %v1790_v1, %v3647_v38 }
 0x41a   :  { %2304 = vst [vmem:[%s4786_s6 + $0x198] sm:$0xff] %v1380_v61  ;;  %v5127_v61 = vld [vmem:[#allocation70_spill] sm:$0xff] }
 0x41b   :  { %2432 = vst [vmem:[%s4786_s6 + $0x398] sm:$0xff] %v2101_v47  ;;  %v1349_v42 = vsub.f32 %v5113_v6, %v1285_v48  ;;  %v2070_v22 = vsub.f32 %v5114_v31, %v2006_v30  ;;  %v5128_v47 = vld [vmem:[#allocation115_spill] sm:$0xff] }
 0x41d   :  { %2242 = vst [vmem:[%s4786_s6 + $0xa0] sm:$0xff] %v1349_v42  ;;  %v1228_v23 = vpop.f32.mrf.mxu2  ;;  %v1886_v57 = vpop.f32.mrf.mxu3  ;;  %v5129_v42 = vld [vmem:[#allocation39_spill] sm:$0xff] }
 0x41e   :  { %v1317_v8 = vmul.f32 %v3647_v38, %v1228_v23  ;;  %2370 = vst [vmem:[%s4786_s6 + $0x2a0] sm:$0xff] %v2070_v22  ;;  %v2038_v53 = vmul.f32 %v1886_v57, %v3647_v38  ;;  %v5130_v22 = vld [vmem:[#allocation93_spill] sm:$0xff] }
 0x420   :  { %v1381_v43 = vsub.f32 %v5115_v5, %v1317_v8  ;;  %v2102_v12 = vsub.f32 %v5116_v2, %v2038_v53  ;;  %v1135_v50 = vpop.f32.mrf.mxu0  ;;  %v1793_v37 = vpop.f32.mrf.mxu1 }
 0x421   :  { %v1286_v39 = vmul.f32 %v3647_v38, %v1135_v50  ;;  %v2007_v32 = vmul.f32 %v1793_v37, %v3647_v38 }
 0x422   :  { %2306 = vst [vmem:[%s4786_s6 + $0x1a0] sm:$0xff] %v1381_v43  ;;  %v5131_v43 = vld [vmem:[#allocation71_spill] sm:$0xff] }
 0x423   :  { %2434 = vst [vmem:[%s4786_s6 + $0x3a0] sm:$0xff] %v2102_v12  ;;  %v1350_v54 = vsub.f32 %v5117_v24, %v1286_v39  ;;  %v2071_v14 = vsub.f32 %v5118_v13, %v2007_v32  ;;  %v5132_v12 = vld [vmem:[#allocation116_spill] sm:$0xff] }
 0x425   :  { %2244 = vst [vmem:[%s4786_s6 + $0xa8] sm:$0xff] %v1350_v54  ;;  %v1231_v46 = vpop.f32.mrf.mxu2  ;;  %v1889_v16 = vpop.f32.mrf.mxu3  ;;  %v5133_v54 = vld [vmem:[#allocation40_spill] sm:$0xff] }
 0x426   :  { %v1318_v58 = vmul.f32 %v3647_v38, %v1231_v46  ;;  %2372 = vst [vmem:[%s4786_s6 + $0x2a8] sm:$0xff] %v2071_v14  ;;  %v2039_v62 = vmul.f32 %v1889_v16, %v3647_v38  ;;  %v5134_v14 = vld [vmem:[#allocation94_spill] sm:$0xff] }
 0x428   :  { %v1382_v60 = vsub.f32 %v5119_v35, %v1318_v58  ;;  %v2103_v29 = vsub.f32 %v5120_v10, %v2039_v62  ;;  %v1138_v33 = vpop.f32.mrf.mxu0  ;;  %v1796_v20 = vpop.f32.mrf.mxu1 }
 0x429   :  { %v1287_v40 = vmul.f32 %v3647_v38, %v1138_v33  ;;  %v2008_v59 = vmul.f32 %v1796_v20, %v3647_v38 }
 0x42a   :  { %2308 = vst [vmem:[%s4786_s6 + $0x1a8] sm:$0xff] %v1382_v60  ;;  %v5135_v60 = vld [vmem:[#allocation72_spill] sm:$0xff] }
 0x42b   :  { %2436 = vst [vmem:[%s4786_s6 + $0x3a8] sm:$0xff] %v2103_v29  ;;  %v1351_v63 = vsub.f32 %v5121_v56, %v1287_v40  ;;  %v2072_v17 = vsub.f32 %v5122_v36, %v2008_v59  ;;  %v5136_v29 = vld [vmem:[#allocation117_spill] sm:$0xff] }
 0x42d   :  { %2246 = vst [vmem:[%s4786_s6 + $0xb0] sm:$0xff] %v1351_v63  ;;  %v1234_v51 = vpop.f32.mrf.mxu2  ;;  %v1892_v28 = vpop.f32.mrf.mxu3  ;;  %v5137_v63 = vld [vmem:[#allocation41_spill] sm:$0xff] }
 0x42e   :  { %v1319_v21 = vmul.f32 %v3647_v38, %v1234_v51  ;;  %2374 = vst [vmem:[%s4786_s6 + $0x2b0] sm:$0xff] %v2072_v17  ;;  %v2040_v41 = vmul.f32 %v1892_v28, %v3647_v38  ;;  %v5138_v17 = vld [vmem:[#allocation95_spill] sm:$0xff] }
 0x430   :  { %v1383_v19 = vsub.f32 %v5123_v44, %v1319_v21  ;;  %v2104_v45 = vsub.f32 %v5124_v7, %v2040_v41  ;;  %v1141_v18 = vpop.f32.mrf.mxu0  ;;  %v1799_v15 = vpop.f32.mrf.mxu1 }
 0x431   :  { %v1288_v52 = vmul.f32 %v3647_v38, %v1141_v18  ;;  %v2009_v34 = vmul.f32 %v1799_v15, %v3647_v38 }
 0x432   :  { %2310 = vst [vmem:[%s4786_s6 + $0x1b0] sm:$0xff] %v1383_v19  ;;  %v5139_v19 = vld [vmem:[#allocation73_spill] sm:$0xff] }
 0x433   :  { %2438 = vst [vmem:[%s4786_s6 + $0x3b0] sm:$0xff] %v2104_v45  ;;  %v1352_v3 = vsub.f32 %v5125_v9, %v1288_v52  ;;  %v2073_v11 = vsub.f32 %v5126_v25, %v2009_v34  ;;  %v5140_v45 = vld [vmem:[#allocation118_spill] sm:$0xff] }
 0x435   :  { %2248 = vst [vmem:[%s4786_s6 + $0xb8] sm:$0xff] %v1352_v3  ;;  %v1237_v49 = vpop.f32.mrf.mxu2  ;;  %v1895_v27 = vpop.f32.mrf.mxu3  ;;  %v5141_v3 = vld [vmem:[#allocation42_spill] sm:$0xff] }
 0x436   :  { %v1320_v4 = vmul.f32 %v3647_v38, %v1237_v49  ;;  %2376 = vst [vmem:[%s4786_s6 + $0x2b8] sm:$0xff] %v2073_v11  ;;  %v2041_v26 = vmul.f32 %v1895_v27, %v3647_v38  ;;  %v5142_v11 = vld [vmem:[#allocation96_spill] sm:$0xff] }
 0x438   :  { %v1384_v0 = vsub.f32 %v5127_v61, %v1320_v4  ;;  %v2105_v55 = vsub.f32 %v5128_v47, %v2041_v26  ;;  %v1144_v1 = vpop.f32.mrf.mxu0  ;;  %v1802_v48 = vpop.f32.mrf.mxu1 }
 0x439   :  { %v1289_v30 = vmul.f32 %v3647_v38, %v1144_v1  ;;  %v2010_v6 = vmul.f32 %v1802_v48, %v3647_v38 }
 0x43a   :  { %2312 = vst [vmem:[%s4786_s6 + $0x1b8] sm:$0xff] %v1384_v0  ;;  %v5143_v0 = vld [vmem:[#allocation74_spill] sm:$0xff] }
 0x43b   :  { %2440 = vst [vmem:[%s4786_s6 + $0x3b8] sm:$0xff] %v2105_v55  ;;  %v1353_v31 = vsub.f32 %v5129_v42, %v1289_v30  ;;  %v2074_v23 = vsub.f32 %v5130_v22, %v2010_v6  ;;  %v5144_v55 = vld [vmem:[#allocation119_spill] sm:$0xff] }
 0x43d   :  { %2250 = vst [vmem:[%s4786_s6 + $0xc0] sm:$0xff] %v1353_v31  ;;  %v1240_v57 = vpop.f32.mrf.mxu2  ;;  %v1898_v8 = vpop.f32.mrf.mxu3  ;;  %v5145_v31 = vld [vmem:[#allocation43_spill] sm:$0xff] }
 0x43e   :  { %v1321_v53 = vmul.f32 %v3647_v38, %v1240_v57  ;;  %2378 = vst [vmem:[%s4786_s6 + $0x2c0] sm:$0xff] %v2074_v23  ;;  %v2042_v5 = vmul.f32 %v1898_v8, %v3647_v38  ;;  %v5146_v23 = vld [vmem:[#allocation97_spill] sm:$0xff] }
 0x440   :  { %v1385_v2 = vsub.f32 %v5131_v43, %v1321_v53  ;;  %v2106_v50 = vsub.f32 %v5132_v12, %v2042_v5  ;;  %v1147_v37 = vpop.f32.mrf.mxu0  ;;  %v1805_v39 = vpop.f32.mrf.mxu1 }
 0x441   :  { %v1290_v32 = vmul.f32 %v3647_v38, %v1147_v37  ;;  %v2011_v24 = vmul.f32 %v1805_v39, %v3647_v38 }
 0x442   :  { %2314 = vst [vmem:[%s4786_s6 + $0x1c0] sm:$0xff] %v1385_v2  ;;  %v5147_v2 = vld [vmem:[#allocation75_spill] sm:$0xff] }
 0x443   :  { %2442 = vst [vmem:[%s4786_s6 + $0x3c0] sm:$0xff] %v2106_v50  ;;  %v1354_v13 = vsub.f32 %v5133_v54, %v1290_v32  ;;  %v2075_v46 = vsub.f32 %v5134_v14, %v2011_v24  ;;  %v5148_v50 = vld [vmem:[#allocation120_spill] sm:$0xff] }
 0x445   :  { %2252 = vst [vmem:[%s4786_s6 + $0xc8] sm:$0xff] %v1354_v13  ;;  %v1243_v16 = vpop.f32.mrf.mxu2  ;;  %v1901_v58 = vpop.f32.mrf.mxu3  ;;  %v5149_v13 = vld [vmem:[#allocation44_spill] sm:$0xff] }
 0x446   :  { %v1322_v62 = vmul.f32 %v3647_v38, %v1243_v16  ;;  %2380 = vst [vmem:[%s4786_s6 + $0x2c8] sm:$0xff] %v2075_v46  ;;  %v2043_v35 = vmul.f32 %v1901_v58, %v3647_v38  ;;  %v5150_v46 = vld [vmem:[#allocation98_spill] sm:$0xff] }
 0x448   :  { %v1386_v10 = vsub.f32 %v5135_v60, %v1322_v62  ;;  %v2107_v33 = vsub.f32 %v5136_v29, %v2043_v35  ;;  %v1150_v20 = vpop.f32.mrf.mxu0  ;;  %v1808_v40 = vpop.f32.mrf.mxu1 }
 0x449   :  { %v1291_v59 = vmul.f32 %v3647_v38, %v1150_v20  ;;  %v2012_v56 = vmul.f32 %v1808_v40, %v3647_v38 }
 0x44a   :  { %2316 = vst [vmem:[%s4786_s6 + $0x1c8] sm:$0xff] %v1386_v10  ;;  %v5151_v10 = vld [vmem:[#allocation76_spill] sm:$0xff] }
 0x44b   :  { %2444 = vst [vmem:[%s4786_s6 + $0x3c8] sm:$0xff] %v2107_v33  ;;  %v1355_v36 = vsub.f32 %v5137_v63, %v1291_v59  ;;  %v2076_v51 = vsub.f32 %v5138_v17, %v2012_v56  ;;  %v5152_v33 = vld [vmem:[#allocation121_spill] sm:$0xff] }
 0x44d   :  { %2254 = vst [vmem:[%s4786_s6 + $0xd0] sm:$0xff] %v1355_v36  ;;  %v1246_v28 = vpop.f32.mrf.mxu2  ;;  %v1904_v21 = vpop.f32.mrf.mxu3  ;;  %v5153_v36 = vld [vmem:[#allocation45_spill] sm:$0xff] }
 0x44e   :  { %v1323_v41 = vmul.f32 %v3647_v38, %v1246_v28  ;;  %2382 = vst [vmem:[%s4786_s6 + $0x2d0] sm:$0xff] %v2076_v51  ;;  %v2044_v44 = vmul.f32 %v1904_v21, %v3647_v38  ;;  %v5154_v51 = vld [vmem:[#allocation99_spill] sm:$0xff] }
 0x450   :  { %v1387_v7 = vsub.f32 %v5139_v19, %v1323_v41  ;;  %v2108_v18 = vsub.f32 %v5140_v45, %v2044_v44  ;;  %v1153_v15 = vpop.f32.mrf.mxu0  ;;  %v1811_v52 = vpop.f32.mrf.mxu1 }
 0x451   :  { %v1292_v34 = vmul.f32 %v3647_v38, %v1153_v15  ;;  %v2013_v9 = vmul.f32 %v1811_v52, %v3647_v38 }
 0x452   :  { %2318 = vst [vmem:[%s4786_s6 + $0x1d0] sm:$0xff] %v1387_v7  ;;  %v5155_v7 = vld [vmem:[#allocation77_spill] sm:$0xff] }
 0x453   :  { %2446 = vst [vmem:[%s4786_s6 + $0x3d0] sm:$0xff] %v2108_v18  ;;  %v1356_v25 = vsub.f32 %v5141_v3, %v1292_v34  ;;  %v2077_v49 = vsub.f32 %v5142_v11, %v2013_v9  ;;  %v5156_v18 = vld [vmem:[#allocation122_spill] sm:$0xff] }
 0x455   :  { %2256 = vst [vmem:[%s4786_s6 + $0xd8] sm:$0xff] %v1356_v25  ;;  %v1249_v27 = vpop.f32.mrf.mxu2  ;;  %v1907_v4 = vpop.f32.mrf.mxu3  ;;  %v5157_v25 = vld [vmem:[#allocation46_spill] sm:$0xff] }
 0x456   :  { %v1324_v26 = vmul.f32 %v3647_v38, %v1249_v27  ;;  %2384 = vst [vmem:[%s4786_s6 + $0x2d8] sm:$0xff] %v2077_v49  ;;  %v2045_v61 = vmul.f32 %v1907_v4, %v3647_v38  ;;  %v5158_v49 = vld [vmem:[#allocation100_spill] sm:$0xff] }
 0x458   :  { %v1388_v47 = vsub.f32 %v5143_v0, %v1324_v26  ;;  %v2109_v1 = vsub.f32 %v5144_v55, %v2045_v61  ;;  %v1156_v48 = vpop.f32.mrf.mxu0  ;;  %v1814_v30 = vpop.f32.mrf.mxu1 }
 0x459   :  { %v1293_v6 = vmul.f32 %v3647_v38, %v1156_v48  ;;  %v2014_v42 = vmul.f32 %v1814_v30, %v3647_v38 }
 0x45a   :  { %2320 = vst [vmem:[%s4786_s6 + $0x1d8] sm:$0xff] %v1388_v47  ;;  %v5159_v47 = vld [vmem:[#allocation78_spill] sm:$0xff] }
 0x45b   :  { %2448 = vst [vmem:[%s4786_s6 + $0x3d8] sm:$0xff] %v2109_v1  ;;  %v1357_v22 = vsub.f32 %v5145_v31, %v1293_v6  ;;  %v2078_v57 = vsub.f32 %v5146_v23, %v2014_v42  ;;  %v5160_v1 = vld [vmem:[#allocation123_spill] sm:$0xff] }
 0x45d   :  { %2258 = vst [vmem:[%s4786_s6 + $0xe0] sm:$0xff] %v1357_v22  ;;  %v1252_v8 = vpop.f32.mrf.mxu2  ;;  %v1910_v53 = vpop.f32.mrf.mxu3 }
 0x45e   :  { %v1325_v5 = vmul.f32 %v3647_v38, %v1252_v8  ;;  %2386 = vst [vmem:[%s4786_s6 + $0x2e0] sm:$0xff] %v2078_v57  ;;  %v2046_v43 = vmul.f32 %v1910_v53, %v3647_v38 }
 0x460   :  { %v1389_v12 = vsub.f32 %v5147_v2, %v1325_v5  ;;  %v2110_v37 = vsub.f32 %v5148_v50, %v2046_v43  ;;  %v1159_v39 = vpop.f32.mrf.mxu0  ;;  %v1817_v32 = vpop.f32.mrf.mxu1 }
 0x461   :  { %v1294_v24 = vmul.f32 %v3647_v38, %v1159_v39  ;;  %v2015_v54 = vmul.f32 %v1817_v32, %v3647_v38 }
 0x462   :  { %2322 = vst [vmem:[%s4786_s6 + $0x1e0] sm:$0xff] %v1389_v12 }
 0x463   :  { %2450 = vst [vmem:[%s4786_s6 + $0x3e0] sm:$0xff] %v2110_v37  ;;  %v1358_v14 = vsub.f32 %v5149_v13, %v1294_v24  ;;  %v2079_v16 = vsub.f32 %v5150_v46, %v2015_v54 }
 0x465   :  { %2260 = vst [vmem:[%s4786_s6 + $0xe8] sm:$0xff] %v1358_v14  ;;  %v1255_v58 = vpop.f32.mrf.mxu2  ;;  %v1913_v62 = vpop.f32.mrf.mxu3 }
 0x466   :  { %v1326_v35 = vmul.f32 %v3647_v38, %v1255_v58  ;;  %2388 = vst [vmem:[%s4786_s6 + $0x2e8] sm:$0xff] %v2079_v16  ;;  %v2047_v60 = vmul.f32 %v1913_v62, %v3647_v38 }
 0x468   :  { %v1390_v29 = vsub.f32 %v5151_v10, %v1326_v35  ;;  %v2111_v20 = vsub.f32 %v5152_v33, %v2047_v60  ;;  %v1162_v40 = vpop.f32.mrf.mxu0  ;;  %v1820_v59 = vpop.f32.mrf.mxu1 }
 0x469   :  { %v1295_v56 = vmul.f32 %v3647_v38, %v1162_v40  ;;  %v2016_v63 = vmul.f32 %v1820_v59, %v3647_v38 }
 0x46a   :  { %2324 = vst [vmem:[%s4786_s6 + $0x1e8] sm:$0xff] %v1390_v29 }
 0x46b   :  { %2452 = vst [vmem:[%s4786_s6 + $0x3e8] sm:$0xff] %v2111_v20  ;;  %v1359_v17 = vsub.f32 %v5153_v36, %v1295_v56  ;;  %v2080_v28 = vsub.f32 %v5154_v51, %v2016_v63 }
 0x46d   :  { %2262 = vst [vmem:[%s4786_s6 + $0xf0] sm:$0xff] %v1359_v17  ;;  %v1258_v21 = vpop.f32.mrf.mxu2  ;;  %v1916_v41 = vpop.f32.mrf.mxu3 }
 0x46e   :  { %v1327_v44 = vmul.f32 %v3647_v38, %v1258_v21  ;;  %2390 = vst [vmem:[%s4786_s6 + $0x2f0] sm:$0xff] %v2080_v28  ;;  %v2048_v19 = vmul.f32 %v1916_v41, %v3647_v38 }
 0x470   :  { %v1391_v45 = vsub.f32 %v5155_v7, %v1327_v44  ;;  %v2112_v15 = vsub.f32 %v5156_v18, %v2048_v19  ;;  %v1165_v52 = vpop.f32.mrf.mxu0  ;;  %v1823_v34 = vpop.f32.mrf.mxu1 }
 0x471   :  { %v1296_v9 = vmul.f32 %v3647_v38, %v1165_v52  ;;  %v2017_v3 = vmul.f32 %v1823_v34, %v3647_v38 }
 0x472   :  { %2326 = vst [vmem:[%s4786_s6 + $0x1f0] sm:$0xff] %v1391_v45 }
 0x473   :  { %2454 = vst [vmem:[%s4786_s6 + $0x3f0] sm:$0xff] %v2112_v15  ;;  %v1360_v11 = vsub.f32 %v5157_v25, %v1296_v9  ;;  %v2081_v27 = vsub.f32 %v5158_v49, %v2017_v3 }
 0x475   :  { %2264 = vst [vmem:[%s4786_s6 + $0xf8] sm:$0xff] %v1360_v11  ;;  %v1261_v4 = vpop.f32.mrf.mxu2  ;;  %v1919_v26 = vpop.f32.mrf.mxu3 }
 0x476   :  { %v1328_v61 = vmul.f32 %v3647_v38, %v1261_v4  ;;  %2392 = vst [vmem:[%s4786_s6 + $0x2f8] sm:$0xff] %v2081_v27  ;;  %v2049_v0 = vmul.f32 %v1919_v26, %v3647_v38 }
 0x478   :  { %v1392_v55 = vsub.f32 %v5159_v47, %v1328_v61  ;;  %v2113_v48 = vsub.f32 %v5160_v1, %v2049_v0 }
 0x47a   :  { %2328 = vst [vmem:[%s4786_s6 + $0x1f8] sm:$0xff] %v1392_v55 }
 0x47b   :  { %2456 = vst [vmem:[%s4786_s6 + $0x3f8] sm:$0xff] %v2113_v48 }
 0x47c   :  { %2462 = vsyncadd [#allocation3], 16384 }
 0x47d   :  { %2710 = dma.done.wait [#allocation3], 16384 }
 0x47e   :  { %2711 = vsyncadd [#allocation3], 4294950912  ;;  %s2474_s10 = sshll.u32 %s4787_s7, 4  ;;  %s2717_s11 = smov [#allocation5]   ;;  %s2475_s10 = int_to_ptr.hbm [resolvable:$true] %s2474_s10 }
 0x47f   :  { %s2472_s2 = sshll.u32 %s2717_s11, 4  ;;  %s2483_s14 = sshll.u32 %s4788_s8, 4  ;;  %s2473_s2 = int_to_ptr.vmem [resolvable:$true] %s2472_s2  ;;  %s2484_s14 = int_to_ptr.vmem [resolvable:$true] %s2483_s14 }
 0x480   :  { %2477 = dma.vmem_to_hbm [thread:$0]  %s2473_s2, 16, %s2475_s10, [#allocation6]  }
 0x481   :  { %s2718_s15 = smov [#allocation8]  }
 0x482   :  { %2486 = dma.smem_to_vmem %s2718_s15, 16, %s2484_s14, [#allocation7]  }
 0x483   :  { %2712 = dma.done.wait [#allocation6], 16  }
 0x484   :  { %2713 = vsyncadd [#allocation6], 4294967280 }
 0x485   :  { %2714 = dma.done.wait [#allocation7], 16  }
 0x486   :  { %2715 = vsyncadd [#allocation7], 4294967280 }
 0x487   :  { %2497 = sfence }
 0x488   :  { %2498 = vsyncpa [#allocation6], 1 }
 0x489   :  { %2499 = vsyncpa [#allocation7], 1 }
 0x48a   :  { %2500 = vsyncmov [#allocation3] }
 0x48d   :  { %s2501_s6 = vpop.sfrf %2500 }
 0x48e   :  { %p2643_p0 = scmp.ne.s32.totalorder %s2501_s6, 0 }
 0x490   :  { %2505 = shalt.err (%p2643_p0)  }

</bundles_post_ra>
